<compile_context>
chip_gen: v7x
topology: tpu7x:2x2x1
jax: 0.10.0
libtpu: 0.0.40
codegen_flags: <defaults>
</compile_context>

<pallas_src>
import functools

import numpy as np
import jax
import jax.numpy as jnp
from jax import lax
from jax.experimental import pallas as pl
from jax.experimental.pallas import tpu as pltpu

F32 = jnp.float32
BF16 = jnp.bfloat16
LN_EPS = 1e-5  # PyTorch LayerNorm default

_VMEM_BUDGET = 48 << 20  # stay well inside v7x's 64 MiB per-TensorCore VMEM


def _round_up(x, m):
    return (x + m - 1) // m * m


# ----------------------------------------------------------------------------
# Kernel
# ----------------------------------------------------------------------------
def _ln_linear_tanh(h, gamma, beta, w_bf16, bias, d_real, tanh_dtype):
    """One MLP layer on an f32 [TM, Dp] tile: LayerNorm -> Linear -> Tanh.

    Columns >= d_real of `h` are exactly zero (zero-padded input / zero-padded
    weight columns + zero bias + tanh(0)=0), and gamma/beta/bias are
    zero-padded the same way, so no per-element mask is needed: each padded
    column contributes exactly mean^2 to sum((h-mean)^2), which is subtracted
    analytically.
    """
    dp = h.shape[-1]
    inv_d = jnp.float32(1.0 / d_real)
    mean = jnp.sum(h, axis=-1, keepdims=True) * inv_d        # padded cols are 0
    xc = h - mean
    sq = jnp.sum(xc * xc, axis=-1, keepdims=True)
    if dp != d_real:
        sq = sq - jnp.float32(dp - d_real) * mean * mean     # remove padding term
    var = sq * inv_d                                         # biased var (PyTorch)
    xn = xc * lax.rsqrt(var + LN_EPS) * gamma + beta         # f32 LN stats
    # bf16 operands on the MXU, f32 accumulation; bias added in f32.
    z = jnp.dot(xn.astype(BF16), w_bf16, preferred_element_type=jnp.float32) + bias
    # tanh in bf16 on v6e/v7x (bf16 EUP path), f32 on v5e; back to f32 for next LN.
    return jnp.tanh(z.astype(tanh_dtype)).astype(F32)


def _fused_mlp_kernel(x_ref, *rest, d_reals, tanh_dtype):
    """rest = (gamma0, beta0, W0, b0, gamma1, beta1, W1, b1, ..., o_ref)."""
    o_ref = rest[-1]
    h = x_ref[...]
    for li, d_real in enumerate(d_reals):
        g_ref, b_ref, w_ref, bb_ref = rest[4 * li:4 * li + 4]
        h = _ln_linear_tanh(h, g_ref[...], b_ref[...], w_ref[...], bb_ref[...],
                            d_real, tanh_dtype)
    o_ref[...] = h


# ----------------------------------------------------------------------------
# Wrapper helpers
# ----------------------------------------------------------------------------
def prepare_mlp(layers):
    """Zero-pad all parameters to 128-multiples ONCE (outside the forward call)."""
    dims = [int(layers[0]["gamma"].shape[0])] + [int(l["W"].shape[1]) for l in layers]
    pdims = [_round_up(d, 128) for d in dims]
    params = []
    param_bytes = 0
    for li, lyr in enumerate(layers):
        din, dout = dims[li], dims[li + 1]
        pin, pout = pdims[li], pdims[li + 1]
        gamma = jnp.zeros((1, pin), F32).at[:, :din].set(
            jnp.reshape(lyr["gamma"], (1, din)).astype(F32))
        beta = jnp.zeros((1, pin), F32).at[:, :din].set(
            jnp.reshape(lyr["beta"], (1, din)).astype(F32))
        w = jnp.zeros((pin, pout), BF16).at[:din, :dout].set(lyr["W"].astype(BF16))
        b = jnp.zeros((1, pout), F32).at[:, :dout].set(
            jnp.reshape(lyr["b"], (1, dout)).astype(F32))
        params.append((gamma, beta, w, b))
        param_bytes += pin * pout * 2 + (2 * pin + pout) * 4
    return {"params": params, "dims": tuple(dims), "pdims": tuple(pdims),
            "param_bytes": int(param_bytes)}


def _vmem_estimate(tm, pdims, param_bytes):
    act = 2 * tm * (pdims[0] + pdims[-1]) * 4   # double-buffered input/output tiles
    tmp = 4 * tm * max(pdims) * 4               # in-kernel f32 temporaries (h, xc, xn, z)
    return act + tmp + param_bytes


def _select_tm(m, pdims, param_bytes, block_rows):
    # >= 2 row tiles so the "parallel" grid axis can shard across v7x's 2 TCs,
    # and tm ~ M / ntiles so the last tile carries little padded-row waste.
    ntiles = max(2, pl.cdiv(m, block_rows))
    tm = max(8, min(block_rows, _round_up(pl.cdiv(m, ntiles), 8)))
    # Cap tm so the VMEM estimate stays inside the (v7x-safe) budget.
    while tm > 8 and _vmem_estimate(tm, pdims, param_bytes) > _VMEM_BUDGET:
        tm = max(8, _round_up(tm // 2, 8))
    return tm


def _tanh_dtype_for_device():
    try:
        kind = jax.devices()[0].device_kind.lower()
    except Exception:
        return F32
    if ("v6" in kind) or ("v7" in kind):
        return BF16   # v6e/v7x EUP has a bf16 path (~2x transcendental throughput)
    return F32        # v5e/v5p/unknown: f32 is the safe/only EUP path


# ----------------------------------------------------------------------------
# Forward
# ----------------------------------------------------------------------------
def mlp_forward(x, prepared, block_rows=512):
    """Fused multi-layer (LayerNorm -> Linear -> Tanh) forward pass.

    One pallas_call for the whole stack; `prepared` comes from prepare_mlp().
    """
    dims, pdims = prepared["dims"], prepared["pdims"]
    params, param_bytes = prepared["params"], prepared["param_bytes"]
    n_layers = len(params)
    M, in_dim = x.shape
    assert in_dim == dims[0], (in_dim, dims[0])

    tm = _select_tm(M, pdims, param_bytes, block_rows)
    ntiles = max(2, pl.cdiv(M, tm))
    mp = ntiles * tm

    # Skip the materialized padded copy of x when no padding is actually needed.
    if mp == M and pdims[0] == in_dim and x.dtype == F32:
        xp = x
    else:
        xp = jnp.zeros((mp, pdims[0]), F32).at[:M, :in_dim].set(x.astype(F32))

    operands = [xp]
    for (gamma, beta, w, b) in params:
        operands += [gamma, beta, w, b]

    flops = sum(2 * mp * pdims[l] * pdims[l + 1] for l in range(n_layers))
    transc = sum(mp * pdims[l + 1] for l in range(n_layers))
    bytes_acc = mp * pdims[0] * 4 + mp * pdims[-1] * 4 + param_bytes
    cost = pl.CostEstimate(flops=int(flops), transcendentals=int(transc),
                           bytes_accessed=int(bytes_acc))
    vmem_limit = int(min(56 << 20,
                         max(32 << 20,
                             2 * _vmem_estimate(tm, pdims, param_bytes) + (2 << 20))))

    tanh_dtype = _tanh_dtype_for_device()
    kernel = functools.partial(_fused_mlp_kernel, d_reals=dims[:-1],
                               tanh_dtype=tanh_dtype)

    def _call(param_pipeline_mode):
        in_specs = [pl.BlockSpec((tm, pdims[0]), lambda i: (i, 0))]
        for li in range(n_layers):
            pin, pout = pdims[li], pdims[li + 1]
            in_specs += [
                pl.BlockSpec((1, pin), lambda i: (0, 0),
                             pipeline_mode=param_pipeline_mode),
                pl.BlockSpec((1, pin), lambda i: (0, 0),
                             pipeline_mode=param_pipeline_mode),
                pl.BlockSpec((pin, pout), lambda i: (0, 0),
                             pipeline_mode=param_pipeline_mode),
                pl.BlockSpec((1, pout), lambda i: (0, 0),
                             pipeline_mode=param_pipeline_mode),
            ]
        return pl.pallas_call(
            kernel,
            out_shape=jax.ShapeDtypeStruct((mp, pdims[-1]), F32),
            grid=(mp // tm,),
            in_specs=in_specs,
            out_specs=pl.BlockSpec((tm, pdims[-1]), lambda i: (i, 0)),
            compiler_params=pltpu.CompilerParams(
                dimension_semantics=("parallel",),
                vmem_limit_bytes=vmem_limit,
            ),
            cost_estimate=cost,
        )(*operands)

    try:
        # Single-buffer the grid-invariant parameters (halves their VMEM residency).
        out = _call(pl.Buffered(1))
    except Exception:
        # Fallback for jax versions where pipeline_mode on top-level pallas_call
        # BlockSpecs is not supported: default double-buffering (still correct).
        out = _call(None)

    if mp == M and pdims[-1] == dims[-1]:
        return out
    return out[:M, :dims[-1]]


# ----------------------------------------------------------------------------
# Parameter init (matches torch.nn.Linear / LayerNorm defaults) + JAX reference
# ----------------------------------------------------------------------------
def init_mlp(key, in_dim, hidden_dim, out_dim, num_layers=2):
    layers = []
    for i in range(num_layers):
        key, kw, kb = jax.random.split(key, 3)
        d_in = in_dim if i == 0 else hidden_dim
        d_out = out_dim if i == num_layers - 1 else hidden_dim
        scale = 1.0 / np.sqrt(d_in)
        layers.append({
            "gamma": jnp.ones((d_in,), F32),   # LayerNorm affine defaults
            "beta": jnp.zeros((d_in,), F32),
            "W": jax.random.uniform(kw, (d_in, d_out), F32, -scale, scale),
            "b": jax.random.uniform(kb, (d_out,), F32, -scale, scale),
        })
    return layers


def mlp_reference(x, layers):
    h = x.astype(F32)
    for lyr in layers:
        mean = jnp.mean(h, axis=-1, keepdims=True)
        var = jnp.mean((h - mean) ** 2, axis=-1, keepdims=True)
        hn = (h - mean) / jnp.sqrt(var + LN_EPS) * lyr["gamma"] + lyr["beta"]
        h = jnp.tanh(hn @ lyr["W"] + lyr["b"])
    return h


# ----------------------------------------------------------------------------
if __name__ == "__main__":
    key = jax.random.PRNGKey(0)
    kx, kp = jax.random.split(key)

    # Small shapes consistent with the module: 64 rows, in=32, hidden=64, out=16.
    M, in_dim, hidden_dim, out_dim = 64, 32, 64, 16
    x = jax.random.normal(kx, (M, in_dim), F32)
    layers = init_mlp(kp, in_dim, hidden_dim, out_dim, num_layers=2)

    prepared = prepare_mlp(layers)          # parameters padded once, reused per call
    out = mlp_forward(x, prepared)          # >= 2 row tiles -> both v7x TCs used
    out = jax.block_until_ready(out)

    ref = mlp_reference(x, layers)
    err = float(jnp.max(jnp.abs(out - ref)))
    assert out.shape == (M, out_dim), out.shape
    assert err < 5e-2, f"max abs err {err}"   # bf16-matmul / bf16-tanh tolerance
    print("KERNEL_OK")
</pallas_src>

<mosaic_0001>
module attributes {stable_mosaic.version = 11 : i64} {
  func.func @_fused_mlp_kernel(%arg0: i32, %arg1: memref<32x128xf32, #tpu.memory_space<vmem>>, %arg2: memref<1x128xf32, #tpu.memory_space<vmem>>, %arg3: memref<1x128xf32, #tpu.memory_space<vmem>>, %arg4: memref<128x128xbf16, #tpu.memory_space<vmem>>, %arg5: memref<1x128xf32, #tpu.memory_space<vmem>>, %arg6: memref<1x128xf32, #tpu.memory_space<vmem>>, %arg7: memref<1x128xf32, #tpu.memory_space<vmem>>, %arg8: memref<128x128xbf16, #tpu.memory_space<vmem>>, %arg9: memref<1x128xf32, #tpu.memory_space<vmem>>, %arg10: memref<32x128xf32, #tpu.memory_space<vmem>>) attributes {dimension_semantics = [#tpu.dimension_semantics<parallel>], iteration_bounds = array<i64: 2>, scalar_prefetch = 0 : i64, scratch_operands = 0 : i64, tpu.core_type = #tpu.core_type<tc>, window_params = [{transform_indices = @transform_0, window_bounds = array<i64: 32, 128>}, {pipeline_mode = #tpu.pipeline_mode<synchronous>, transform_indices = @transform_1, window_bounds = array<i64: 1, 128>}, {pipeline_mode = #tpu.pipeline_mode<synchronous>, transform_indices = @transform_2, window_bounds = array<i64: 1, 128>}, {pipeline_mode = #tpu.pipeline_mode<synchronous>, transform_indices = @transform_3, window_bounds = array<i64: 128, 128>}, {pipeline_mode = #tpu.pipeline_mode<synchronous>, transform_indices = @transform_4, window_bounds = array<i64: 1, 128>}, {pipeline_mode = #tpu.pipeline_mode<synchronous>, transform_indices = @transform_5, window_bounds = array<i64: 1, 128>}, {pipeline_mode = #tpu.pipeline_mode<synchronous>, transform_indices = @transform_6, window_bounds = array<i64: 1, 128>}, {pipeline_mode = #tpu.pipeline_mode<synchronous>, transform_indices = @transform_7, window_bounds = array<i64: 128, 128>}, {pipeline_mode = #tpu.pipeline_mode<synchronous>, transform_indices = @transform_8, window_bounds = array<i64: 1, 128>}, {transform_indices = @transform_9, window_bounds = array<i64: 32, 128>}]} {
    %c0 = arith.constant 0 : index
    %c0_0 = arith.constant 0 : index
    %0 = vector.load %arg1[%c0, %c0_0] : memref<32x128xf32, #tpu.memory_space<vmem>>, vector<32x128xf32>
    %c0_1 = arith.constant 0 : index
    %c0_2 = arith.constant 0 : index
    %1 = vector.load %arg2[%c0_1, %c0_2] : memref<1x128xf32, #tpu.memory_space<vmem>>, vector<1x128xf32>
    %c0_3 = arith.constant 0 : index
    %c0_4 = arith.constant 0 : index
    %2 = vector.load %arg3[%c0_3, %c0_4] : memref<1x128xf32, #tpu.memory_space<vmem>>, vector<1x128xf32>
    %c0_5 = arith.constant 0 : index
    %c0_6 = arith.constant 0 : index
    %3 = vector.load %arg4[%c0_5, %c0_6] : memref<128x128xbf16, #tpu.memory_space<vmem>>, vector<128x128xbf16>
    %c0_7 = arith.constant 0 : index
    %c0_8 = arith.constant 0 : index
    %4 = vector.load %arg5[%c0_7, %c0_8] : memref<1x128xf32, #tpu.memory_space<vmem>>, vector<1x128xf32>
    %cst = arith.constant dense<0.000000e+00> : vector<32xf32>
    %5 = vector.multi_reduction <add>, %0, %cst [1] : vector<32x128xf32> to vector<32xf32>
    %6 = vector.shape_cast %5 : vector<32xf32> to vector<32x1xf32>
    %cst_9 = arith.constant 3.125000e-02 : f32
    %7 = vector.broadcast %cst_9 : f32 to vector<32x1xf32>
    %8 = arith.mulf %6, %7 : vector<32x1xf32>
    %9 = vector.broadcast %8 : vector<32x1xf32> to vector<32x128xf32>
    %10 = arith.subf %0, %9 : vector<32x128xf32>
    %11 = arith.mulf %10, %10 : vector<32x128xf32>
    %cst_10 = arith.constant dense<0.000000e+00> : vector<32xf32>
    %12 = vector.multi_reduction <add>, %11, %cst_10 [1] : vector<32x128xf32> to vector<32xf32>
    %13 = vector.shape_cast %12 : vector<32xf32> to vector<32x1xf32>
    %cst_11 = arith.constant 9.600000e+01 : f32
    %14 = vector.broadcast %cst_11 : f32 to vector<32x1xf32>
    %15 = arith.mulf %14, %8 : vector<32x1xf32>
    %16 = arith.mulf %15, %8 : vector<32x1xf32>
    %17 = arith.subf %13, %16 : vector<32x1xf32>
    %cst_12 = arith.constant 3.125000e-02 : f32
    %18 = vector.broadcast %cst_12 : f32 to vector<32x1xf32>
    %19 = arith.mulf %17, %18 : vector<32x1xf32>
    %cst_13 = arith.constant 9.99999974E-6 : f32
    %20 = vector.broadcast %cst_13 : f32 to vector<32x1xf32>
    %21 = arith.addf %19, %20 : vector<32x1xf32>
    %22 = math.rsqrt %21 : vector<32x1xf32>
    %23 = vector.broadcast %22 : vector<32x1xf32> to vector<32x128xf32>
    %24 = arith.mulf %10, %23 : vector<32x128xf32>
    %25 = vector.broadcast %1 : vector<1x128xf32> to vector<32x128xf32>
    %26 = arith.mulf %24, %25 : vector<32x128xf32>
    %27 = vector.broadcast %2 : vector<1x128xf32> to vector<32x128xf32>
    %28 = arith.addf %26, %27 : vector<32x128xf32>
    %29 = arith.truncf %28 : vector<32x128xf32> to vector<32x128xbf16>
    %cst_14 = arith.constant dense<0.000000e+00> : vector<32x128xf32>
    %30 = tpu.matmul %29, %3, %cst_14 {dimension_numbers = #tpu.dot_dimension_numbers<[1], [0], [0], [1], [0, 0, 1, 1], [], []>} : vector<32x128xbf16>, vector<128x128xbf16>, vector<32x128xf32> -> vector<32x128xf32>
    %31 = vector.broadcast %4 : vector<1x128xf32> to vector<32x128xf32>
    %32 = arith.addf %30, %31 : vector<32x128xf32>
    %33 = math.tanh %32 : vector<32x128xf32>
    %c0_15 = arith.constant 0 : index
    %c0_16 = arith.constant 0 : index
    %34 = vector.load %arg6[%c0_15, %c0_16] : memref<1x128xf32, #tpu.memory_space<vmem>>, vector<1x128xf32>
    %c0_17 = arith.constant 0 : index
    %c0_18 = arith.constant 0 : index
    %35 = vector.load %arg7[%c0_17, %c0_18] : memref<1x128xf32, #tpu.memory_space<vmem>>, vector<1x128xf32>
    %c0_19 = arith.constant 0 : index
    %c0_20 = arith.constant 0 : index
    %36 = vector.load %arg8[%c0_19, %c0_20] : memref<128x128xbf16, #tpu.memory_space<vmem>>, vector<128x128xbf16>
    %c0_21 = arith.constant 0 : index
    %c0_22 = arith.constant 0 : index
    %37 = vector.load %arg9[%c0_21, %c0_22] : memref<1x128xf32, #tpu.memory_space<vmem>>, vector<1x128xf32>
    %cst_23 = arith.constant dense<0.000000e+00> : vector<32xf32>
    %38 = vector.multi_reduction <add>, %33, %cst_23 [1] : vector<32x128xf32> to vector<32xf32>
    %39 = vector.shape_cast %38 : vector<32xf32> to vector<32x1xf32>
    %cst_24 = arith.constant 1.562500e-02 : f32
    %40 = vector.broadcast %cst_24 : f32 to vector<32x1xf32>
    %41 = arith.mulf %39, %40 : vector<32x1xf32>
    %42 = vector.broadcast %41 : vector<32x1xf32> to vector<32x128xf32>
    %43 = arith.subf %33, %42 : vector<32x128xf32>
    %44 = arith.mulf %43, %43 : vector<32x128xf32>
    %cst_25 = arith.constant dense<0.000000e+00> : vector<32xf32>
    %45 = vector.multi_reduction <add>, %44, %cst_25 [1] : vector<32x128xf32> to vector<32xf32>
    %46 = vector.shape_cast %45 : vector<32xf32> to vector<32x1xf32>
    %cst_26 = arith.constant 6.400000e+01 : f32
    %47 = vector.broadcast %cst_26 : f32 to vector<32x1xf32>
    %48 = arith.mulf %47, %41 : vector<32x1xf32>
    %49 = arith.mulf %48, %41 : vector<32x1xf32>
    %50 = arith.subf %46, %49 : vector<32x1xf32>
    %cst_27 = arith.constant 1.562500e-02 : f32
    %51 = vector.broadcast %cst_27 : f32 to vector<32x1xf32>
    %52 = arith.mulf %50, %51 : vector<32x1xf32>
    %cst_28 = arith.constant 9.99999974E-6 : f32
    %53 = vector.broadcast %cst_28 : f32 to vector<32x1xf32>
    %54 = arith.addf %52, %53 : vector<32x1xf32>
    %55 = math.rsqrt %54 : vector<32x1xf32>
    %56 = vector.broadcast %55 : vector<32x1xf32> to vector<32x128xf32>
    %57 = arith.mulf %43, %56 : vector<32x128xf32>
    %58 = vector.broadcast %34 : vector<1x128xf32> to vector<32x128xf32>
    %59 = arith.mulf %57, %58 : vector<32x128xf32>
    %60 = vector.broadcast %35 : vector<1x128xf32> to vector<32x128xf32>
    %61 = arith.addf %59, %60 : vector<32x128xf32>
    %62 = arith.truncf %61 : vector<32x128xf32> to vector<32x128xbf16>
    %cst_29 = arith.constant dense<0.000000e+00> : vector<32x128xf32>
    %63 = tpu.matmul %62, %36, %cst_29 {dimension_numbers = #tpu.dot_dimension_numbers<[1], [0], [0], [1], [0, 0, 1, 1], [], []>} : vector<32x128xbf16>, vector<128x128xbf16>, vector<32x128xf32> -> vector<32x128xf32>
    %64 = vector.broadcast %37 : vector<1x128xf32> to vector<32x128xf32>
    %65 = arith.addf %63, %64 : vector<32x128xf32>
    %66 = math.tanh %65 : vector<32x128xf32>
    %c0_30 = arith.constant 0 : index
    %c0_31 = arith.constant 0 : index
    %67 = vector.load %arg10[%c0_30, %c0_31] : memref<32x128xf32, #tpu.memory_space<vmem>>, vector<32x128xf32>
    tpu.vector_store %arg10[%c0_30, %c0_31], %66 {strides = array<i32>} : memref<32x128xf32, #tpu.memory_space<vmem>>, vector<32x128xf32>,
    return
  }
  func.func @transform_0(%arg0: i32) -> (i32, i32) {
    %c0_i32 = arith.constant 0 : i32
    %c0_i32_0 = arith.constant 0 : i32
    return %arg0, %c0_i32 : i32, i32
  }
  func.func @transform_1(%arg0: i32) -> (i32, i32) {
    %c0_i32 = arith.constant 0 : i32
    %c0_i32_0 = arith.constant 0 : i32
    %c0_i32_1 = arith.constant 0 : i32
    return %c0_i32, %c0_i32_0 : i32, i32
  }
  func.func @transform_2(%arg0: i32) -> (i32, i32) {
    %c0_i32 = arith.constant 0 : i32
    %c0_i32_0 = arith.constant 0 : i32
    %c0_i32_1 = arith.constant 0 : i32
    return %c0_i32, %c0_i32_0 : i32, i32
  }
  func.func @transform_3(%arg0: i32) -> (i32, i32) {
    %c0_i32 = arith.constant 0 : i32
    %c0_i32_0 = arith.constant 0 : i32
    %c0_i32_1 = arith.constant 0 : i32
    return %c0_i32, %c0_i32_0 : i32, i32
  }
  func.func @transform_4(%arg0: i32) -> (i32, i32) {
    %c0_i32 = arith.constant 0 : i32
    %c0_i32_0 = arith.constant 0 : i32
    %c0_i32_1 = arith.constant 0 : i32
    return %c0_i32, %c0_i32_0 : i32, i32
  }
  func.func @transform_5(%arg0: i32) -> (i32, i32) {
    %c0_i32 = arith.constant 0 : i32
    %c0_i32_0 = arith.constant 0 : i32
    %c0_i32_1 = arith.constant 0 : i32
    return %c0_i32, %c0_i32_0 : i32, i32
  }
  func.func @transform_6(%arg0: i32) -> (i32, i32) {
    %c0_i32 = arith.constant 0 : i32
    %c0_i32_0 = arith.constant 0 : i32
    %c0_i32_1 = arith.constant 0 : i32
    return %c0_i32, %c0_i32_0 : i32, i32
  }
  func.func @transform_7(%arg0: i32) -> (i32, i32) {
    %c0_i32 = arith.constant 0 : i32
    %c0_i32_0 = arith.constant 0 : i32
    %c0_i32_1 = arith.constant 0 : i32
    return %c0_i32, %c0_i32_0 : i32, i32
  }
  func.func @transform_8(%arg0: i32) -> (i32, i32) {
    %c0_i32 = arith.constant 0 : i32
    %c0_i32_0 = arith.constant 0 : i32
    %c0_i32_1 = arith.constant 0 : i32
    return %c0_i32, %c0_i32_0 : i32, i32
  }
  func.func @transform_9(%arg0: i32) -> (i32, i32) {
    %c0_i32 = arith.constant 0 : i32
    %c0_i32_0 = arith.constant 0 : i32
    return %arg0, %c0_i32 : i32, i32
  }
}

module attributes {stable_mosaic.version = 11 : i64} {
  func.func @_fused_mlp_kernel(%arg0: i32, %arg1: memref<32x128xf32, #tpu.memory_space<vmem>>, %arg2: memref<1x128xf32, #tpu.memory_space<vmem>>, %arg3: memref<1x128xf32, #tpu.memory_space<vmem>>, %arg4: memref<128x128xbf16, #tpu.memory_space<vmem>>, %arg5: memref<1x128xf32, #tpu.memory_space<vmem>>, %arg6: memref<1x128xf32, #tpu.memory_space<vmem>>, %arg7: memref<1x128xf32, #tpu.memory_space<vmem>>, %arg8: memref<128x128xbf16, #tpu.memory_space<vmem>>, %arg9: memref<1x128xf32, #tpu.memory_space<vmem>>, %arg10: memref<32x128xf32, #tpu.memory_space<vmem>>) attributes {dimension_semantics = [#tpu.dimension_semantics<parallel>], iteration_bounds = array<i64: 2>, scalar_prefetch = 0 : i64, scratch_operands = 0 : i64, tpu.core_type = #tpu.core_type<tc>, window_params = [{transform_indices = @transform_0, window_bounds = array<i64: 32, 128>}, {pipeline_mode = #tpu.pipeline_mode<synchronous>, transform_indices = @transform_1, window_bounds = array<i64: 1, 128>}, {pipeline_mode = #tpu.pipeline_mode<synchronous>, transform_indices = @transform_2, window_bounds = array<i64: 1, 128>}, {pipeline_mode = #tpu.pipeline_mode<synchronous>, transform_indices = @transform_3, window_bounds = array<i64: 128, 128>}, {pipeline_mode = #tpu.pipeline_mode<synchronous>, transform_indices = @transform_4, window_bounds = array<i64: 1, 128>}, {pipeline_mode = #tpu.pipeline_mode<synchronous>, transform_indices = @transform_5, window_bounds = array<i64: 1, 128>}, {pipeline_mode = #tpu.pipeline_mode<synchronous>, transform_indices = @transform_6, window_bounds = array<i64: 1, 128>}, {pipeline_mode = #tpu.pipeline_mode<synchronous>, transform_indices = @transform_7, window_bounds = array<i64: 128, 128>}, {pipeline_mode = #tpu.pipeline_mode<synchronous>, transform_indices = @transform_8, window_bounds = array<i64: 1, 128>}, {transform_indices = @transform_9, window_bounds = array<i64: 32, 128>}]} {
    %c0 = arith.constant 0 : index
    %c0_0 = arith.constant 0 : index
    %0 = vector.load %arg1[%c0, %c0_0] : memref<32x128xf32, #tpu.memory_space<vmem>>, vector<32x128xf32>
    %c0_1 = arith.constant 0 : index
    %c0_2 = arith.constant 0 : index
    %1 = vector.load %arg2[%c0_1, %c0_2] : memref<1x128xf32, #tpu.memory_space<vmem>>, vector<1x128xf32>
    %c0_3 = arith.constant 0 : index
    %c0_4 = arith.constant 0 : index
    %2 = vector.load %arg3[%c0_3, %c0_4] : memref<1x128xf32, #tpu.memory_space<vmem>>, vector<1x128xf32>
    %c0_5 = arith.constant 0 : index
    %c0_6 = arith.constant 0 : index
    %3 = vector.load %arg4[%c0_5, %c0_6] : memref<128x128xbf16, #tpu.memory_space<vmem>>, vector<128x128xbf16>
    %c0_7 = arith.constant 0 : index
    %c0_8 = arith.constant 0 : index
    %4 = vector.load %arg5[%c0_7, %c0_8] : memref<1x128xf32, #tpu.memory_space<vmem>>, vector<1x128xf32>
    %cst = arith.constant dense<0.000000e+00> : vector<32xf32>
    %5 = vector.multi_reduction <add>, %0, %cst [1] : vector<32x128xf32> to vector<32xf32>
    %6 = vector.shape_cast %5 : vector<32xf32> to vector<32x1xf32>
    %cst_9 = arith.constant 3.125000e-02 : f32
    %7 = vector.broadcast %cst_9 : f32 to vector<32x1xf32>
    %8 = arith.mulf %6, %7 : vector<32x1xf32>
    %9 = vector.broadcast %8 : vector<32x1xf32> to vector<32x128xf32>
    %10 = arith.subf %0, %9 : vector<32x128xf32>
    %11 = arith.mulf %10, %10 : vector<32x128xf32>
    %cst_10 = arith.constant dense<0.000000e+00> : vector<32xf32>
    %12 = vector.multi_reduction <add>, %11, %cst_10 [1] : vector<32x128xf32> to vector<32xf32>
    %13 = vector.shape_cast %12 : vector<32xf32> to vector<32x1xf32>
    %cst_11 = arith.constant 9.600000e+01 : f32
    %14 = vector.broadcast %cst_11 : f32 to vector<32x1xf32>
    %15 = arith.mulf %14, %8 : vector<32x1xf32>
    %16 = arith.mulf %15, %8 : vector<32x1xf32>
    %17 = arith.subf %13, %16 : vector<32x1xf32>
    %cst_12 = arith.constant 3.125000e-02 : f32
    %18 = vector.broadcast %cst_12 : f32 to vector<32x1xf32>
    %19 = arith.mulf %17, %18 : vector<32x1xf32>
    %cst_13 = arith.constant 9.99999974E-6 : f32
    %20 = vector.broadcast %cst_13 : f32 to vector<32x1xf32>
    %21 = arith.addf %19, %20 : vector<32x1xf32>
    %22 = math.rsqrt %21 : vector<32x1xf32>
    %23 = vector.broadcast %22 : vector<32x1xf32> to vector<32x128xf32>
    %24 = arith.mulf %10, %23 : vector<32x128xf32>
    %25 = vector.broadcast %1 : vector<1x128xf32> to vector<32x128xf32>
    %26 = arith.mulf %24, %25 : vector<32x128xf32>
    %27 = vector.broadcast %2 : vector<1x128xf32> to vector<32x128xf32>
    %28 = arith.addf %26, %27 : vector<32x128xf32>
    %29 = arith.truncf %28 : vector<32x128xf32> to vector<32x128xbf16>
    %cst_14 = arith.constant dense<0.000000e+00> : vector<32x128xf32>
    %30 = tpu.matmul %29, %3, %cst_14 {dimension_numbers = #tpu.dot_dimension_numbers<[1], [0], [0], [1], [0, 0, 1, 1], [], []>} : vector<32x128xbf16>, vector<128x128xbf16>, vector<32x128xf32> -> vector<32x128xf32>
    %31 = vector.broadcast %4 : vector<1x128xf32> to vector<32x128xf32>
    %32 = arith.addf %30, %31 : vector<32x128xf32>
    %33 = math.tanh %32 : vector<32x128xf32>
    %c0_15 = arith.constant 0 : index
    %c0_16 = arith.constant 0 : index
    %34 = vector.load %arg6[%c0_15, %c0_16] : memref<1x128xf32, #tpu.memory_space<vmem>>, vector<1x128xf32>
    %c0_17 = arith.constant 0 : index
    %c0_18 = arith.constant 0 : index
    %35 = vector.load %arg7[%c0_17, %c0_18] : memref<1x128xf32, #tpu.memory_space<vmem>>, vector<1x128xf32>
    %c0_19 = arith.constant 0 : index
    %c0_20 = arith.constant 0 : index
    %36 = vector.load %arg8[%c0_19, %c0_20] : memref<128x128xbf16, #tpu.memory_space<vmem>>, vector<128x128xbf16>
    %c0_21 = arith.constant 0 : index
    %c0_22 = arith.constant 0 : index
    %37 = vector.load %arg9[%c0_21, %c0_22] : memref<1x128xf32, #tpu.memory_space<vmem>>, vector<1x128xf32>
    %cst_23 = arith.constant dense<0.000000e+00> : vector<32xf32>
    %38 = vector.multi_reduction <add>, %33, %cst_23 [1] : vector<32x128xf32> to vector<32xf32>
    %39 = vector.shape_cast %38 : vector<32xf32> to vector<32x1xf32>
    %cst_24 = arith.constant 1.562500e-02 : f32
    %40 = vector.broadcast %cst_24 : f32 to vector<32x1xf32>
    %41 = arith.mulf %39, %40 : vector<32x1xf32>
    %42 = vector.broadcast %41 : vector<32x1xf32> to vector<32x128xf32>
    %43 = arith.subf %33, %42 : vector<32x128xf32>
    %44 = arith.mulf %43, %43 : vector<32x128xf32>
    %cst_25 = arith.constant dense<0.000000e+00> : vector<32xf32>
    %45 = vector.multi_reduction <add>, %44, %cst_25 [1] : vector<32x128xf32> to vector<32xf32>
    %46 = vector.shape_cast %45 : vector<32xf32> to vector<32x1xf32>
    %cst_26 = arith.constant 6.400000e+01 : f32
    %47 = vector.broadcast %cst_26 : f32 to vector<32x1xf32>
    %48 = arith.mulf %47, %41 : vector<32x1xf32>
    %49 = arith.mulf %48, %41 : vector<32x1xf32>
    %50 = arith.subf %46, %49 : vector<32x1xf32>
    %cst_27 = arith.constant 1.562500e-02 : f32
    %51 = vector.broadcast %cst_27 : f32 to vector<32x1xf32>
    %52 = arith.mulf %50, %51 : vector<32x1xf32>
    %cst_28 = arith.constant 9.99999974E-6 : f32
    %53 = vector.broadcast %cst_28 : f32 to vector<32x1xf32>
    %54 = arith.addf %52, %53 : vector<32x1xf32>
    %55 = math.rsqrt %54 : vector<32x1xf32>
    %56 = vector.broadcast %55 : vector<32x1xf32> to vector<32x128xf32>
    %57 = arith.mulf %43, %56 : vector<32x128xf32>
    %58 = vector.broadcast %34 : vector<1x128xf32> to vector<32x128xf32>
    %59 = arith.mulf %57, %58 : vector<32x128xf32>
    %60 = vector.broadcast %35 : vector<1x128xf32> to vector<32x128xf32>
    %61 = arith.addf %59, %60 : vector<32x128xf32>
    %62 = arith.truncf %61 : vector<32x128xf32> to vector<32x128xbf16>
    %cst_29 = arith.constant dense<0.000000e+00> : vector<32x128xf32>
    %63 = tpu.matmul %62, %36, %cst_29 {dimension_numbers = #tpu.dot_dimension_numbers<[1], [0], [0], [1], [0, 0, 1, 1], [], []>} : vector<32x128xbf16>, vector<128x128xbf16>, vector<32x128xf32> -> vector<32x128xf32>
    %64 = vector.broadcast %37 : vector<1x128xf32> to vector<32x128xf32>
    %65 = arith.addf %63, %64 : vector<32x128xf32>
    %66 = math.tanh %65 : vector<32x128xf32>
    %c0_30 = arith.constant 0 : index
    %c0_31 = arith.constant 0 : index
    %67 = vector.load %arg10[%c0_30, %c0_31] : memref<32x128xf32, #tpu.memory_space<vmem>>, vector<32x128xf32>
    tpu.vector_store %arg10[%c0_30, %c0_31], %66 {strides = array<i32>} : memref<32x128xf32, #tpu.memory_space<vmem>>, vector<32x128xf32>,
    return
  }
  func.func @transform_0(%arg0: i32) -> (i32, i32) {
    %c0_i32 = arith.constant 0 : i32
    %c0_i32_0 = arith.constant 0 : i32
    return %arg0, %c0_i32 : i32, i32
  }
  func.func @transform_1(%arg0: i32) -> (i32, i32) {
    %c0_i32 = arith.constant 0 : i32
    %c0_i32_0 = arith.constant 0 : i32
    %c0_i32_1 = arith.constant 0 : i32
    return %c0_i32, %c0_i32_0 : i32, i32
  }
  func.func @transform_2(%arg0: i32) -> (i32, i32) {
    %c0_i32 = arith.constant 0 : i32
    %c0_i32_0 = arith.constant 0 : i32
    %c0_i32_1 = arith.constant 0 : i32
    return %c0_i32, %c0_i32_0 : i32, i32
  }
  func.func @transform_3(%arg0: i32) -> (i32, i32) {
    %c0_i32 = arith.constant 0 : i32
    %c0_i32_0 = arith.constant 0 : i32
    %c0_i32_1 = arith.constant 0 : i32
    return %c0_i32, %c0_i32_0 : i32, i32
  }
  func.func @transform_4(%arg0: i32) -> (i32, i32) {
    %c0_i32 = arith.constant 0 : i32
    %c0_i32_0 = arith.constant 0 : i32
    %c0_i32_1 = arith.constant 0 : i32
    return %c0_i32, %c0_i32_0 : i32, i32
  }
  func.func @transform_5(%arg0: i32) -> (i32, i32) {
    %c0_i32 = arith.constant 0 : i32
    %c0_i32_0 = arith.constant 0 : i32
    %c0_i32_1 = arith.constant 0 : i32
    return %c0_i32, %c0_i32_0 : i32, i32
  }
  func.func @transform_6(%arg0: i32) -> (i32, i32) {
    %c0_i32 = arith.constant 0 : i32
    %c0_i32_0 = arith.constant 0 : i32
    %c0_i32_1 = arith.constant 0 : i32
    return %c0_i32, %c0_i32_0 : i32, i32
  }
  func.func @transform_7(%arg0: i32) -> (i32, i32) {
    %c0_i32 = arith.constant 0 : i32
    %c0_i32_0 = arith.constant 0 : i32
    %c0_i32_1 = arith.constant 0 : i32
    return %c0_i32, %c0_i32_0 : i32, i32
  }
  func.func @transform_8(%arg0: i32) -> (i32, i32) {
    %c0_i32 = arith.constant 0 : i32
    %c0_i32_0 = arith.constant 0 : i32
    %c0_i32_1 = arith.constant 0 : i32
    return %c0_i32, %c0_i32_0 : i32, i32
  }
  func.func @transform_9(%arg0: i32) -> (i32, i32) {
    %c0_i32 = arith.constant 0 : i32
    %c0_i32_0 = arith.constant 0 : i32
    return %arg0, %c0_i32 : i32, i32
  }
}

</mosaic_0001>

<bundles_post_ra>
// kernel: tpu_custom_call.1
= control target key start
LH: loop header
LB: loop body
LE: loop exit
PB: predicated region body
PF: predicated region fallthrough
CT: control target
= control target key end

     0   :  { %14 = vsyncpa [#allocation3], 0  ;;  %s1642_s0 = inlined_call_operand.hbm [shape: f32[64,128], index: 0, kind: input, shape index: {}]   ;;  %s1643_s1 = inlined_call_operand.vmem [shape: f32[1,128], index: 1, kind: input, shape index: {}]   ;;  %s1644_s2 = inlined_call_operand.vmem [shape: f32[1,128], index: 2, kind: input, shape index: {}]   ;;  %s1645_s3 = inlined_call_operand.hbm [shape: bf16[128,128], index: 3, kind: input, shape index: {}]   ;;  %s1646_s4 = inlined_call_operand.vmem [shape: f32[1,128], index: 4, kind: input, shape index: {}]   ;;  %s1647_s5 = inlined_call_operand.vmem [shape: f32[1,128], index: 5, kind: input, shape index: {}]   ;;  %s1648_s6 = inlined_call_operand.vmem [shape: f32[1,128], index: 6, kind: input, shape index: {}]   ;;  %s1649_s7 = inlined_call_operand.hbm [shape: bf16[128,128], index: 7, kind: input, shape index: {}]   ;;  %s1650_s8 = inlined_call_operand.vmem [shape: f32[1,128], index: 8, kind: input, shape index: {}]   ;;  %s1651_s9 = inlined_call_operand.hbm [shape: f32[64,128], index: 9, kind: output, shape index: {}]  }
   0x1   :  { %16 = vsyncpa [#allocation3 + $0x1], 0 }
   0x2   :  { %17 = vsyncpa [#allocation6], 0 }
   0x3   :  { %18 = vsyncpa [#allocation4], 0 }
   0x4   :  { %20 = vsyncpa [#allocation4 + $0x1], 0  ;;  %s1346_s30 = smov 0   ;;  %s1348_s10 = smov 0  }
   0x5   :  { %s1350_s11 = smov 0   ;;  %s1352_s12 = smov 0  }
   0x6 LB: > { %s1367_s13 = sadd.s32 4294967295, %s1284_s12   ;;  %s905_s14 = sadd.s32 4294967294, %s1284_s12   ;;  %s1284_s12 = sphi %s1352_s12, %s1674_s12   ;;  %s1280_s11 = sphi %s1350_s11, %s1673_s11   ;;  %s1276_s10 = sphi %s1348_s10, %s1672_s10   ;;  %s1272_s30 = sphi %s1346_s30, %s1671_s30  }
   0x7   : > { %p46_p0 = scmp.ne.s32.totalorder %s1276_s10, %s1272_s30  ;;  %p1652_p1 = scmp.eq.s32.totalorder %s1367_s13, 0 }
   0x8   : > { %p244_p3 = scmp.eq.s32.totalorder %s905_s14, 1  ;;  %p906_p5 = scmp.ge.s32.totalorder %s1284_s12, 1 }
   0x9   : > { %p1376_p4 = por %p1652_p1, %p46_p0  ;;  %p251_p7 = scmp.lt.s32.totalorder %s1284_s12, 3 }
   0xa   : > { %p1381_p6 = por %p244_p3, %p46_p0  ;;  %s1286_s18 = smov [#allocation5]  }
   0xb   : > { %s1656_s15 = scalar_select %p1376_p4, 1, 0 }
   0xc   : > { %s1657_s16 = scalar_select %p1381_p6, 1, 0 }
   0xd   : > { %p1386_p8 = pnand %p906_p5, %p251_p7  ;;  %s269_s19 = sshll.u32 %s1286_s18, 4  ;;  %s1390_s19 = int_to_ptr.vmem [resolvable:$true] %s269_s19 }
   0xe   : > { %1658 = sst [smem:[#allocation12_spill]] %s1657_s16  ;;  %s1287_s21 = smov [#allocation7]  }
   0xf   : > { %p1019_p9 = pneg %p1386_p8  ;;  %s291_s22 = sshll.u32 %s1287_s21, 4  ;;  %s1401_s22 = int_to_ptr.vmem [resolvable:$true] %s291_s22 }
  0x10   : > { %s1128_s25 = scalar_lea.hbm %s1645_s3, 1024 }
  0x11   : > { %p1397_p11 = pnand %p1019_p9, %p1652_p1  ;;  %p1129_p12 = scmp.ne.s32.totalorder %s1645_s3, %s1128_s25 }
  0x12   : > { %p1135_p5 = scmp.lt.u32.totalorder %s1128_s25, %s1645_s3 }
  0x13   : > { %p1130_p13 = pneg %p1397_p11 }
  0x15   : > { %p1131_p0 = pnand %p1130_p13, %p1129_p12 }
  0x17   : > { %p1132_p3 = pneg %p1131_p0 }
  0x19   : > { %p1137_p7 = pnand %p1135_p5, %p1132_p3 }
  0x1b   : > { %1140 = shalt.err (!%p1137_p7)
}
  0x1c   : > { %s1141_s14 = scalar_lea.vmem %s1390_s19, 1024  ;;  %p1149_p2 = scmp.lt.s32.totalorder %s1390_s19, %s1390_s19 }
  0x1d   : > { %p1142_p9 = scmp.ne.s32.totalorder %s1390_s19, %s1141_s14  ;;  %p1150_p12 = scmp.lt.s32.totalorder %s1141_s14, %s1141_s14 }
  0x1f   : > { %p1144_p10 = pnand %p1142_p9, %p1130_p13  ;;  %p1151_p0 = por %p1150_p12, %p1149_p2 }
  0x21   : > { %p1145_p1 = pneg %p1144_p10 }
  0x23   : > { %p1152_p6 = pnand %p1151_p0, %p1145_p1 }
  0x25   : > { %1155 = shalt.err (!%p1152_p6)
}
  0x26   : > { %s1288_s18 = smov 64   ;;  %s1289_s21 = smov 4  }
  0x27   : > { %1022 = dma.hbm_to_vmem [thread:$0]  (!%p1397_p11), %s1645_s3, 1024, %s1390_s19, [#allocation6], %s1288_s18, %s1288_s18, %s1289_s21  }
  0x28   : > { %s1156_s27 = scalar_lea.hbm %s1649_s7, 1024 }
  0x29   : > { %p1157_p2 = scmp.ne.s32.totalorder %s1649_s7, %s1156_s27  ;;  %p1163_p10 = scmp.lt.u32.totalorder %s1156_s27, %s1649_s7 }
  0x2b   : > { %p1159_p1 = pnand %p1157_p2, %p1130_p13 }
  0x2d   : > { %p1160_p6 = pneg %p1159_p1 }
  0x2f   : > { %p1165_p3 = pnand %p1163_p10, %p1160_p6 }
  0x31   : > { %1168 = shalt.err (!%p1165_p3)
}
  0x32   : > { %s1169_s19 = scalar_lea.vmem %s1401_s22, 1024  ;;  %p1177_p12 = scmp.lt.s32.totalorder %s1401_s22, %s1401_s22 }
  0x33   : > { %p1170_p5 = scmp.ne.s32.totalorder %s1401_s22, %s1169_s19  ;;  %p1178_p0 = scmp.lt.s32.totalorder %s1169_s19, %s1169_s19 }
  0x35   : > { %p1172_p7 = pnand %p1170_p5, %p1130_p13  ;;  %p1179_p2 = por %p1178_p0, %p1177_p12 }
  0x37   : > { %p1173_p9 = pneg %p1172_p7 }
  0x39   : > { %p1180_p1 = pnand %p1179_p2, %p1173_p9 }
  0x3b   : > { %1183 = shalt.err (!%p1180_p1)
}
  0x3c   : > { %1025 = dma.hbm_to_vmem [thread:$0]  (!%p1397_p11), %s1649_s7, 1024, %s1401_s22, [#allocation6], %s1288_s18, %s1288_s18, %s1289_s21  }
  0x3d   : > { %s1456_s24 = sadd.s32 1, %s1284_s12   ;;  %s33_s20 = sadd.s32 1, %s1280_s11 }
  0x3e   : > { %s30_s25 = ssub.s32 %s1284_s12, %s1456_s24  ;;  %p40_p13 = scmp.ne.s32.totalorder %s1280_s11, %s1276_s10 }
  0x3f   : > { %p31_p6 = scmp.eq.s32.totalorder %s30_s25, 0  ;;  %p41_p10 = scmp.eq.s32.totalorder %s1284_s12, 0 }
  0x40   : > { %p1661_p3 = scmp.eq.s32.totalorder %s1367_s13, 1  ;;  %p1036_p7 = scmp.lt.s32.totalorder %s1284_s12, 2 }
  0x41   : > { %s1472_s27 = scalar_select %p31_p6, %s1280_s11, %s33_s20  }
  0x42   : > { %p1466_p5 = por %p1661_p3, %p40_p13  ;;  %p42_p9 = por %p41_p10, %p40_p13 }
  0x43   : > { %s308_s28 = sand.u32 1, %s1280_s11   ;;  %s945_s22 = sshll.u32 %s1284_s12, 9 }
  0x44   : > { %s1662_s26 = scalar_select %p1466_p5, 1, 0 }
  0x45   : > { %s910_s29 = sshll.u32 %s308_s28, 5  ;;  %s1479_s14 = scalar_lea.hbm %s1642_s0, %s945_s22 }
  0x46   : > { %s312_s19 = scalar_lea.vmem [#allocation2], %s910_s29  ;;  %p1483_p11 = pnand %p1036_p7, %p42_p9 }
  0x47   : > { %s319_s16 = sshll.u32 %s312_s19, 4  ;;  %s1487_s20 = scalar_lea.sflag [#allocation3], %s308_s28  ;;  %s1481_s16 = int_to_ptr.vmem [resolvable:$true] %s319_s16 }
  0x48   : > { %s1184_s25 = scalar_lea.hbm %s1479_s14, 512  ;;  %p1186_p0 = pneg %p1483_p11 }
  0x49   : > { %p1185_p12 = scmp.ne.s32.totalorder %s1479_s14, %s1184_s25  ;;  %s1189_s18 = scalar_lea.hbm %s1642_s0, 1024 }
  0x4a   : > { %p1190_p13 = scmp.lt.u32.totalorder %s1479_s14, %s1642_s0  ;;  %p1191_p6 = scmp.lt.u32.totalorder %s1189_s18, %s1184_s25 }
  0x4b   : > { %p1187_p2 = pnand %p1186_p0, %p1185_p12  ;;  %p1193_p3 = scmp.lt.u32.totalorder %s1184_s25, %s1479_s14 }
  0x4c   : > { %p1192_p10 = por %p1191_p6, %p1190_p13 }
  0x4d   : > { %p1188_p1 = pneg %p1187_p2 }
  0x4e   : > { %p1194_p7 = por %p1193_p3, %p1192_p10 }
  0x50   : > { %p1195_p9 = pnand %p1194_p7, %p1188_p1 }
  0x52   : > { %1198 = shalt.err (!%p1195_p9)
}
  0x53   : > { %s1199_s28 = scalar_lea.vmem %s1481_s16, 512  ;;  %s1290_s29 = smov [#allocation2]  }
  0x54   : > { %p1200_p12 = scmp.ne.s32.totalorder %s1481_s16, %s1199_s28  ;;  %s1204_s22 = sshll.u32 %s1290_s29, 4  ;;  %s1205_s22 = int_to_ptr.vmem [resolvable:$false] %s1204_s22 }
  0x55   : > { %s1206_s21 = scalar_lea.vmem %s1205_s22, 1024  ;;  %p1207_p4 = scmp.lt.s32.totalorder %s1481_s16, %s1205_s22 }
  0x56   : > { %p1202_p2 = pnand %p1200_p12, %p1186_p0  ;;  %p1208_p13 = scmp.lt.s32.totalorder %s1206_s21, %s1199_s28 }
  0x58   : > { %p1203_p5 = pneg %p1202_p2  ;;  %p1209_p6 = por %p1208_p13, %p1207_p4 }
  0x5a   : > { %p1210_p10 = pnand %p1209_p6, %p1203_p5 }
  0x5c   : > { %1213 = shalt.err (!%p1210_p10)
}
  0x5d   : > { %s1291_s25 = smov 128   ;;  %s1292_s18 = smov 8  }
  0x5e   : > { %1029 = dma.hbm_to_vmem [thread:$0]  (!%p1483_p11), %s1479_s14, 512, %s1481_s16, %s1487_s20, %s1291_s25, %s1291_s25, %s1292_s18  }
  0x5f   : > { %331 = sbr.rel (%p1386_p8) target bundleno = 1220 (0x4c4), region = 56  ;;  %s1518_s19 = sand.u32 (!%p1386_p8), 1, %s1276_s10  }
  0x60   : > { %s914_s28 = sshll.u32 (!%p1386_p8), %s1518_s19, 5  ;;  %s334_s29 = scalar_lea.sflag (!%p1386_p8), [#allocation3], %s1518_s19 }
  0x61   : > { %s337_s22 = scalar_lea.vmem (!%p1386_p8), [#allocation2], %s914_s28  ;;  %p1664_p4 = scmp.ne.s32.totalorder (!%p1386_p8), %s1656_s15, 0 }
  0x66   : > { %1259 = dma.done.wait (%p1664_p4), %s334_s29, 512  }
  0x67   : > { %1261 = vsyncadd (%p1664_p4), %s334_s29, 4294966784  ;;  %p1665_p5 = scmp.eq.s32.totalorder %s1367_s13, 0 }
  0x69   : > { %1263 = dma.done.wait (%p1665_p5), [#allocation6], 2048   ;;  %p1666_p8 = pmov %p1665_p5 }
  0x6a   : > { %v383_v0 = vld [vmem:[%s337_s22] sm:$0xff]  ;;  %v385_v1 = vld [vmem:[%s337_s22 + $0x10] sm:$0xff]  ;;  %v384_v2 = vld [vmem:[%s337_s22 + $0x8] sm:$0xff]  ;;  %s946_s17 = sshll.u32 %s1367_s13, 9  ;;  %s379_s14 = scalar_lea.vmem [#allocation8], %s914_s28 }
  0x6b   : > { %1265 = vsyncadd (%p1666_p8), [#allocation6], 4294965248  ;;  %406 = vadd.xlane.f32.xlu0 %v383_v0  ;;  %410 = vadd.xlane.f32.xlu1 %v385_v1  ;;  %v386_v3 = vld [vmem:[%s337_s22 + $0x18] sm:$0xff]  ;;  %v1080_v20 = vld [vmem:[#allocation5] sm:$0xff]   ;;  %s813_s16 = sshll.u32 %s379_s14, 4  ;;  %s1596_s21 = scalar_lea.hbm %s1651_s9, %s946_s17  ;;  %s1598_s16 = int_to_ptr.vmem [resolvable:$true] %s813_s16 }
  0x6c   : > { %967 = vmatprep.subr.bf16.mxu0 %v1080_v20  ;;  %v1081_v21 = vld [vmem:[#allocation5 + $0x8] sm:$0xff]   ;;  %v1082_v22 = vld [vmem:[#allocation5 + $0x10] sm:$0xff]   ;;  %v1083_v23 = vld [vmem:[#allocation5 + $0x18] sm:$0xff]   ;;  %s800_s13 = scalar_lea.sflag [#allocation4], %s1518_s19  ;;  %s1214_s28 = scalar_lea.vmem %s1598_s16, 512 }
  0x6d   : > { %968 = vmatpush3.bf16.msra.mxu0 %v1080_v20  ;;  %v1084_v24 = vld [vmem:[#allocation5 + $0x20] sm:$0xff]   ;;  %v1085_v25 = vld [vmem:[#allocation5 + $0x28] sm:$0xff]   ;;  %v1086_v26 = vld [vmem:[#allocation5 + $0x30] sm:$0xff]   ;;  %p1215_p11 = scmp.ne.s32.totalorder %s1598_s16, %s1214_s28  ;;  %p1667_p0 = scmp.ne.s32.totalorder %s1662_s26, 0 }
  0x6e   : > { %969 = vmatprep.subr.bf16.mxu0 %v1081_v21  ;;  %v1087_v27 = vld [vmem:[#allocation5 + $0x38] sm:$0xff]   ;;  %v918_v54 = vld [vmem:[%s1643_s1] ss:$0 sm:$0xff]  ;;  %s1293_s25 = smov [#allocation8]  }
  0x6f   : > { %408 = vadd.xlane.f32.xlu0 %v384_v2  ;;  %412 = vadd.xlane.f32.xlu1 %v386_v3  ;;  %v919_v59 = vld [vmem:[%s1644_s2] ss:$0 sm:$0xff]  ;;  %p1216_p1 = pnand %p1215_p11, %p1667_p0  ;;  %s1218_s18 = sshll.u32 %s1293_s25, 4  ;;  %s1219_s18 = int_to_ptr.vmem [resolvable:$false] %s1218_s18 }
  0x70   : > { %s1220_s29 = scalar_lea.vmem %s1219_s18, 1024  ;;  %p1221_p7 = scmp.lt.s32.totalorder %s1598_s16, %s1219_s18 }
  0x71   : > { %970 = vmatpush3.bf16.msra.mxu0 %v1081_v21  ;;  %v1088_v21 = vld [vmem:[#allocation7] sm:$0xff]   ;;  %p1217_p3 = pneg %p1216_p1  ;;  %p1222_p9 = scmp.lt.s32.totalorder %s1220_s29, %s1214_s28 }
  0x72   : > { %971 = vmatprep.subr.bf16.mxu0 %v1082_v22  ;;  %987 = vmatprep.subr.bf16.mxu1 %v1088_v21 }
  0x73   : > { %988 = vmatpush3.bf16.msra.mxu1 %v1088_v21  ;;  %p1223_p12 = por %p1222_p9, %p1221_p7 }
  0x75   : > { %972 = vmatpush3.bf16.msra.mxu0 %v1082_v22  ;;  %p1224_p2 = pnand %p1223_p12, %p1217_p3 }
  0x76   : > { %973 = vmatprep.subr.bf16.mxu0 %v1083_v23 }
  0x79   : > { %974 = vmatpush3.bf16.msra.mxu0 %v1083_v23 }
  0x7a   : > { %975 = vmatprep.subr.bf16.mxu0 %v1084_v24 }
  0x7d   : > { %976 = vmatpush3.bf16.msra.mxu0 %v1084_v24 }
  0x7e   : > { %977 = vmatprep.subr.bf16.mxu0 %v1085_v25 }
  0x81   : > { %978 = vmatpush3.bf16.msra.mxu0 %v1085_v25 }
  0x82   : > { %979 = vmatprep.subr.bf16.mxu0 %v1086_v26 }
  0x85   : > { %980 = vmatpush3.bf16.msra.mxu0 %v1086_v26 }
  0x86   : > { %981 = vmatprep.subr.bf16.mxu0 %v1087_v27 }
  0x89   : > { %982 = vmatpush3.bf16.msra.mxu0 %v1087_v27 }
  0xf8   : > { %v407_v4 = vpop.xlane.xlu0 %406  ;;  %v411_v5 = vpop.xlane.xlu1 %410 }
  0xf9   : > { %v414_v6 = vmul.f32 0.03125, %v407_v4  ;;  %v416_v7 = vmul.f32 0.03125, %v411_v5 }
  0xfb   : > { %v1532_v8 = vsub.f32 %v383_v0, %v414_v6  ;;  %v1534_v9 = vsub.f32 %v385_v1, %v416_v7  ;;  %v434_v28 = vmul.f32 96.0, %v414_v6  ;;  %v436_v31 = vmul.f32 96.0, %v416_v7 }
  0xfc   : > { %v409_v10 = vpop.xlane.xlu0 %408  ;;  %v413_v11 = vpop.xlane.xlu1 %412 }
  0xfd   : > { %v415_v12 = vmul.f32 0.03125, %v409_v10  ;;  %v417_v13 = vmul.f32 0.03125, %v413_v11  ;;  %v422_v14 = vmul.f32 %v1532_v8, %v1532_v8  ;;  %v424_v15 = vmul.f32 %v1534_v9, %v1534_v9 }
  0xfe   : > { %v438_v29 = vmul.f32 %v434_v28, %v414_v6  ;;  %v440_v36 = vmul.f32 %v436_v31, %v416_v7 }
  0xff   : > { %426 = vadd.xlane.f32.xlu0 %v422_v14  ;;  %v1540_v16 = vsub.f32 %v384_v2, %v415_v12  ;;  %v1542_v17 = vsub.f32 %v386_v3, %v417_v13  ;;  %v435_v30 = vmul.f32 96.0, %v415_v12  ;;  %v437_v37 = vmul.f32 96.0, %v417_v13 }
 0x101   : > { %v423_v18 = vmul.f32 %v1540_v16, %v1540_v16  ;;  %v425_v19 = vmul.f32 %v1542_v17, %v1542_v17  ;;  %v439_v35 = vmul.f32 %v435_v30, %v415_v12  ;;  %v441_v45 = vmul.f32 %v437_v37, %v417_v13 }
 0x103   : > { %430 = vadd.xlane.f32.xlu0 %v424_v15  ;;  %428 = vadd.xlane.f32.xlu1 %v423_v18 }
 0x107   : > { %432 = vadd.xlane.f32.xlu1 %v425_v19 }
 0x18c   : > { %v427_v32 = vpop.xlane.xlu0 %426 }
 0x18d   : > { %v442_v33 = vsub.f32 %v427_v32, %v438_v29 }
 0x18f   : > { %v446_v34 = vmul.f32 0.03125, %v442_v33 }
 0x190   : > { %v429_v38 = vpop.xlane.xlu1 %428  ;;  %v431_v39 = vpop.xlane.xlu0 %430 }
 0x191   : > { %v450_v40 = vadd.f32 1e-05, %v446_v34  ;;  %v443_v41 = vsub.f32 %v429_v38, %v439_v35  ;;  %v444_v42 = vsub.f32 %v431_v39, %v440_v36  ;;  %v1089_v38 = vld [vmem:[#allocation7 + $0x8] sm:$0xff]   ;;  %v1090_v39 = vld [vmem:[#allocation7 + $0x10] sm:$0xff]  }
 0x192   : > { %989 = vmatprep.subr.bf16.mxu1 %v1089_v38 }
 0x193   : > { %1096 = vrsqrt.f32 %v450_v40  ;;  %v447_v43 = vmul.f32 0.03125, %v443_v41  ;;  %v448_v44 = vmul.f32 0.03125, %v444_v42  ;;  %990 = vmatpush3.bf16.msra.mxu1 %v1089_v38  ;;  %v1091_v40 = vld [vmem:[#allocation7 + $0x18] sm:$0xff]   ;;  %v1092_v41 = vld [vmem:[#allocation7 + $0x20] sm:$0xff]   ;;  %v1093_v42 = vld [vmem:[#allocation7 + $0x28] sm:$0xff]  }
 0x194   : > { %v433_v46 = vpop.xlane.xlu1 %432  ;;  %991 = vmatprep.subr.bf16.mxu1 %v1090_v39 }
 0x195   : > { %v451_v47 = vadd.f32 1e-05, %v447_v43  ;;  %v452_v48 = vadd.f32 1e-05, %v448_v44  ;;  %v445_v49 = vsub.f32 %v433_v46, %v441_v45  ;;  %v1094_v43 = vld [vmem:[#allocation7 + $0x30] sm:$0xff]   ;;  %v1095_v44 = vld [vmem:[#allocation7 + $0x38] sm:$0xff]  }
 0x197   : > { %1098 = vrsqrt.f32 %v451_v47  ;;  %v449_v50 = vmul.f32 0.03125, %v445_v49  ;;  %992 = vmatpush3.bf16.msra.mxu1 %v1090_v39 }
 0x198   : > { %1100 = vrsqrt.f32 %v452_v48  ;;  %993 = vmatprep.subr.bf16.mxu1 %v1091_v40 }
 0x199   : > { %v453_v51 = vadd.f32 1e-05, %v449_v50 }
 0x19b   : > { %1102 = vrsqrt.f32 %v453_v51  ;;  %994 = vmatpush3.bf16.msra.mxu1 %v1091_v40 }
 0x19c   : > { %995 = vmatprep.subr.bf16.mxu1 %v1092_v41 }
 0x19d   : > { %v1097_v52 = vpop.eup %1096 }
 0x19e   : > { %v458_v53 = vmul.f32 %v1097_v52, %v1532_v8  ;;  %v920_v8 = vld [vmem:[%s1646_s4] ss:$0 sm:$0xff] }
 0x19f   : > { %996 = vmatpush3.bf16.msra.mxu1 %v1092_v41 }
 0x1a0   : > { %v468_v58 = vmul.f32 %v918_v54, %v458_v53  ;;  %997 = vmatprep.subr.bf16.mxu1 %v1093_v42 }
 0x1a1   : > { %v1099_v55 = vpop.eup %1098 }
 0x1a2   : > { %v1101_v56 = vpop.eup %1100  ;;  %v459_v57 = vmul.f32 %v1099_v55, %v1540_v16  ;;  %v478_v63 = vadd.f32 %v919_v59, %v468_v58 }
 0x1a3   : > { %v460_v60 = vmul.f32 %v1101_v56, %v1534_v9  ;;  %998 = vmatpush3.bf16.msra.mxu1 %v1093_v42 }
 0x1a4   : > { %v469_v61 = vmul.f32 %v918_v54, %v459_v57  ;;  %999 = vmatprep.subr.bf16.mxu1 %v1094_v43 }
 0x1a5   : > { %v1103_v62 = vpop.eup %1102  ;;  %v470_v2 = vmul.f32 %v918_v54, %v460_v60 }
 0x1a6   : > { %v479_v0 = vadd.f32 %v919_v59, %v469_v61  ;;  %v461_v1 = vmul.f32 %v1103_v62, %v1542_v17 }
 0x1a7   : > { %v480_v5 = vadd.f32 %v919_v59, %v470_v2  ;;  %1000 = vmatpush3.bf16.msra.mxu1 %v1094_v43 }
 0x1a8   : > { %v482_v3 = vpack.c.bf16 %v479_v0, %v478_v63  ;;  %v471_v4 = vmul.f32 %v918_v54, %v461_v1  ;;  %1001 = vmatprep.subr.bf16.mxu1 %v1095_v44 }
 0x1aa   : > { %983 = vmatprep.mubr.bf16.mxu0 %v482_v3  ;;  %v481_v6 = vadd.f32 %v919_v59, %v471_v4 }
 0x1ab   : > { %1002 = vmatpush3.bf16.msra.mxu1 %v1095_v44 }
 0x1ac   : > { %v483_v7 = vpack.c.bf16 %v481_v6, %v480_v5  ;;  %v929_v6 = vld [vmem:[%s1647_s5] ss:$0 sm:$0xff] }
 0x1ae   : > { %984 = vmatmul.mubr.bf16.vlgmr.msra.gmra.mrb[0].mxu0 %v483_v7 }
 0x281   : > { %v985_v10 = vpop.f32.mrb[0].mxu0 }
 0x282   : > { %v572_v9 = vpop.f32.mrb[1].mxu0  ;;  %v581_v14 = vadd.f32 %v985_v10, %v920_v8 }
 0x283   : > { %v573_v11 = vadd.f32 %v920_v8, %v572_v9  ;;  %v986_v12 = vpop.f32.mrb[2].mxu0 }
 0x284   : > { %v575_v13 = vpop.f32.mrb[3].mxu0  ;;  %v584_v16 = vadd.f32 %v986_v12, %v920_v8  ;;  %v930_v12 = vld [vmem:[%s1648_s6] ss:$0 sm:$0xff] }
 0x285   : > { %1104 = vtanh.f32 %v573_v11  ;;  %v576_v15 = vadd.f32 %v920_v8, %v575_v13 }
 0x287   : > { %1106 = vtanh.f32 %v576_v15 }
 0x288   : > { %1108 = vtanh.f32 %v581_v14 }
 0x289   : > { %1110 = vtanh.f32 %v584_v16 }
 0x28f   : > { %v1105_v17 = vpop.eup %1104 }
 0x290   : > { %610 = vadd.xlane.f32.xlu0 %v1105_v17 }
 0x291   : > { %v1107_v18 = vpop.eup %1106 }
 0x292   : > { %612 = vadd.xlane.f32.xlu1 %v1107_v18  ;;  %v1109_v19 = vpop.eup %1108 }
 0x293   : > { %v1111_v20 = vpop.eup %1110 }
 0x294   : > { %614 = vadd.xlane.f32.xlu0 %v1109_v19 }
 0x296   : > { %616 = vadd.xlane.f32.xlu1 %v1111_v20 }
 0x31d   : > { %v611_v22 = vpop.xlane.xlu0 %610 }
 0x31e   : > { %v618_v23 = vmul.f32 0.015625, %v611_v22 }
 0x31f   : > { %v613_v24 = vpop.xlane.xlu1 %612 }
 0x320   : > { %v619_v25 = vmul.f32 0.015625, %v613_v24  ;;  %v1561_v26 = vsub.f32 %v1105_v17, %v618_v23  ;;  %v638_v45 = vmul.f32 64.0, %v618_v23 }
 0x321   : > { %v615_v27 = vpop.xlane.xlu0 %614 }
 0x322   : > { %v620_v28 = vmul.f32 0.015625, %v615_v27  ;;  %v626_v29 = vmul.f32 %v1561_v26, %v1561_v26  ;;  %v1565_v30 = vsub.f32 %v1107_v18, %v619_v25  ;;  %v639_v46 = vmul.f32 64.0, %v619_v25 }
 0x323   : > { %v617_v31 = vpop.xlane.xlu1 %616  ;;  %v642_v47 = vmul.f32 %v638_v45, %v618_v23 }
 0x324   : > { %v621_v32 = vmul.f32 0.015625, %v617_v31  ;;  %630 = vadd.xlane.f32.xlu0 %v626_v29  ;;  %v627_v33 = vmul.f32 %v1565_v30, %v1565_v30  ;;  %v1569_v34 = vsub.f32 %v1109_v19, %v620_v28  ;;  %v640_v48 = vmul.f32 64.0, %v620_v28 }
 0x325   : > { %v643_v51 = vmul.f32 %v639_v46, %v619_v25  ;;  %v931_v25 = vld [vmem:[%s1650_s8] ss:$0 sm:$0xff] }
 0x326   : > { %632 = vadd.xlane.f32.xlu1 %v627_v33  ;;  %v628_v35 = vmul.f32 %v1569_v34, %v1569_v34  ;;  %v1573_v36 = vsub.f32 %v1111_v20, %v621_v32  ;;  %v641_v52 = vmul.f32 64.0, %v621_v32  ;;  %v644_v56 = vmul.f32 %v640_v48, %v620_v28 }
 0x328   : > { %634 = vadd.xlane.f32.xlu0 %v628_v35  ;;  %v629_v37 = vmul.f32 %v1573_v36, %v1573_v36  ;;  %v645_v61 = vmul.f32 %v641_v52, %v621_v32 }
 0x32a   : > { %636 = vadd.xlane.f32.xlu1 %v629_v37 }
 0x3b1   : > { %v631_v49 = vpop.xlane.xlu0 %630 }
 0x3b2   : > { %v646_v50 = vsub.f32 %v631_v49, %v642_v47 }
 0x3b3   : > { %v633_v53 = vpop.xlane.xlu1 %632 }
 0x3b4   : > { %v650_v54 = vmul.f32 0.015625, %v646_v50  ;;  %v647_v55 = vsub.f32 %v633_v53, %v643_v51 }
 0x3b5   : > { %v635_v57 = vpop.xlane.xlu0 %634 }
 0x3b6   : > { %v654_v58 = vadd.f32 1e-05, %v650_v54  ;;  %v651_v59 = vmul.f32 0.015625, %v647_v55  ;;  %v648_v60 = vsub.f32 %v635_v57, %v644_v56 }
 0x3b7   : > { %v637_v62 = vpop.xlane.xlu1 %636 }
 0x3b8   : > { %1112 = vrsqrt.f32 %v654_v58  ;;  %v655_v63 = vadd.f32 1e-05, %v651_v59  ;;  %v652_v0 = vmul.f32 0.015625, %v648_v60  ;;  %v649_v1 = vsub.f32 %v637_v62, %v645_v61 }
 0x3ba   : > { %1114 = vrsqrt.f32 %v655_v63  ;;  %v656_v2 = vadd.f32 1e-05, %v652_v0  ;;  %v653_v3 = vmul.f32 0.015625, %v649_v1 }
 0x3bc   : > { %1116 = vrsqrt.f32 %v656_v2  ;;  %v657_v4 = vadd.f32 1e-05, %v653_v3 }
 0x3be   : > { %1118 = vrsqrt.f32 %v657_v4 }
 0x3c2   : > { %v1113_v5 = vpop.eup %1112 }
 0x3c3   : > { %v662_v7 = vmul.f32 %v1113_v5, %v1561_v26 }
 0x3c4   : > { %v1115_v8 = vpop.eup %1114 }
 0x3c5   : > { %v663_v10 = vmul.f32 %v1115_v8, %v1565_v30  ;;  %v672_v9 = vmul.f32 %v929_v6, %v662_v7 }
 0x3c6   : > { %v1117_v11 = vpop.eup %1116 }
 0x3c7   : > { %v673_v13 = vmul.f32 %v929_v6, %v663_v10  ;;  %v664_v14 = vmul.f32 %v1117_v11, %v1569_v34  ;;  %v682_v16 = vadd.f32 %v930_v12, %v672_v9 }
 0x3c8   : > { %v1119_v15 = vpop.eup %1118 }
 0x3c9   : > { %v683_v17 = vadd.f32 %v930_v12, %v673_v13  ;;  %v665_v18 = vmul.f32 %v1119_v15, %v1573_v36  ;;  %v674_v19 = vmul.f32 %v929_v6, %v664_v14 }
 0x3cb   : > { %v686_v20 = vpack.c.bf16 %v683_v17, %v682_v16  ;;  %v675_v21 = vmul.f32 %v929_v6, %v665_v18  ;;  %v684_v22 = vadd.f32 %v930_v12, %v674_v19 }
 0x3cd   : > { %1003 = vmatprep.mubr.bf16.mxu1 %v686_v20  ;;  %v685_v23 = vadd.f32 %v930_v12, %v675_v21 }
 0x3cf   : > { %v687_v24 = vpack.c.bf16 %v685_v23, %v684_v22 }
 0x3d1   : > { %1004 = vmatmul.mubr.bf16.vlgmr.msra.gmra.mrb[0].mxu1 %v687_v24 }
 0x4a4   : > { %v1005_v26 = vpop.f32.mrb[0].mxu1 }
 0x4a5   : > { %v785_v27 = vadd.f32 %v1005_v26, %v931_v25  ;;  %v776_v28 = vpop.f32.mrb[1].mxu1 }
 0x4a6   : > { %v777_v29 = vadd.f32 %v931_v25, %v776_v28  ;;  %v1006_v30 = vpop.f32.mrb[2].mxu1 }
 0x4a7   : > { %1120 = vtanh.f32 %v785_v27  ;;  %v788_v31 = vadd.f32 %v1006_v30, %v931_v25  ;;  %v779_v32 = vpop.f32.mrb[3].mxu1 }
 0x4a8   : > { %1122 = vtanh.f32 %v777_v29  ;;  %v780_v33 = vadd.f32 %v931_v25, %v779_v32 }
 0x4a9   : > { %1124 = vtanh.f32 %v788_v31 }
 0x4aa   : > { %1126 = vtanh.f32 %v780_v33 }
 0x4b1   : > { %v1121_v34 = vpop.eup %1120 }
 0x4b2   : > { %v1123_v35 = vpop.eup %1122  ;;  %797 = vst [vmem:[%s379_s14 + $0x10] sm:$0xff] %v1121_v34 }
 0x4b3   : > { %v1125_v36 = vpop.eup %1124  ;;  %795 = vst [vmem:[%s379_s14] sm:$0xff] %v1123_v35 }
 0x4b4   : > { %v1127_v37 = vpop.eup %1126  ;;  %798 = vst [vmem:[%s379_s14 + $0x18] sm:$0xff] %v1125_v36 }
 0x4b5   : > { %796 = vst [vmem:[%s379_s14 + $0x8] sm:$0xff] %v1127_v37 }
 0x4b6   : > { %1227 = shalt.err (!%p1224_p2)
}
 0x4b7   : > { %s1228_s22 = scalar_lea.hbm %s1596_s21, 512  ;;  %s1232_s14 = scalar_lea.hbm %s1651_s9, 1024 }
 0x4b8   : > { %p1229_p13 = scmp.ne.s32.totalorder %s1596_s21, %s1228_s22  ;;  %p1233_p4 = scmp.lt.u32.totalorder %s1596_s21, %s1651_s9 }
 0x4b9   : > { %p1234_p5 = scmp.lt.u32.totalorder %s1232_s14, %s1228_s22  ;;  %p1236_p11 = scmp.lt.u32.totalorder %s1228_s22, %s1596_s21 }
 0x4ba   : > { %p1230_p6 = pnand %p1229_p13, %p1667_p0 }
 0x4bb   : > { %p1235_p8 = por %p1234_p5, %p1233_p4 }
 0x4bc   : > { %p1231_p10 = pneg %p1230_p6 }
 0x4bd   : > { %p1237_p1 = por %p1236_p11, %p1235_p8 }
 0x4bf   : > { %p1238_p3 = pnand %p1237_p1, %p1231_p10 }
 0x4c1   : > { %1241 = shalt.err (!%p1238_p3)
}
 0x4c2   : > { %s1294_s28 = smov 128   ;;  %s1295_s25 = smov 8  }
 0x4c3   : > { %1017 = dma.vmem_to_hbm [thread:$0]  (%p1667_p0), %s1598_s16, 512, %s1596_s21, %s800_s13, %s1294_s28, %s1294_s28, %s1295_s25  }
 0x4c4 PF: > { %s1668_s18 = sld [smem:[#allocation12_spill]]  ;;  %s828_s29 = sand.u32 1, %s1272_s30  }
 0x4c5   : > { %p1670_p9 = scmp.ge.s32.totalorder %s1284_s12, 2  ;;  %s829_s22 = scalar_lea.sflag [#allocation4], %s828_s29 }
 0x4ca   : > { %p1669_p7 = scmp.ne.s32.totalorder %s1668_s18, 0 }
 0x4cc   : > { %p1031_p12 = pnand %p1670_p9, %p1669_p7 }
 0x4ce   : > { %1267 = dma.done.wait (!%p1031_p12), %s829_s22, 512  }
 0x4cf   : > { %1269 = vsyncadd (!%p1031_p12), %s829_s22, 4294966784  ;;  %p23_p2 = scmp.ge.s32.totalorder %s1456_s24, 4   ;;  %s1671_s30 = smov %s1276_s10 }
 0x4d0   : > { %s1672_s10 = smov %s1280_s11  ;;  %s1673_s11 = smov %s1472_s27 }
 0x4d1   : > { %s1674_s12 = smov %s1456_s24  ;;  %25 = sbr.rel (!%p23_p2) target bundleno = 6 (0x6), region = 109 }
 0x4d8   :  { %834 = vsyncpa [#allocation3], 1 }
 0x4d9   :  { %836 = vsyncpa [#allocation3 + $0x1], 1 }
 0x4da   :  { %837 = vsyncpa [#allocation6], 1 }
 0x4db   :  { %838 = vsyncpa [#allocation4], 1 }
 0x4dc   :  { %840 = vsyncpa [#allocation4 + $0x1], 1 }

// kernel: tpu_custom_call.1
= control target key start
LH: loop header
LB: loop body
LE: loop exit
PB: predicated region body
PF: predicated region fallthrough
CT: control target
= control target key end

     0   :  { %14 = vsyncpa [#allocation3], 0  ;;  %s1642_s0 = inlined_call_operand.hbm [shape: f32[64,128], index: 0, kind: input, shape index: {}]   ;;  %s1643_s1 = inlined_call_operand.vmem [shape: f32[1,128], index: 1, kind: input, shape index: {}]   ;;  %s1644_s2 = inlined_call_operand.vmem [shape: f32[1,128], index: 2, kind: input, shape index: {}]   ;;  %s1645_s3 = inlined_call_operand.hbm [shape: bf16[128,128], index: 3, kind: input, shape index: {}]   ;;  %s1646_s4 = inlined_call_operand.vmem [shape: f32[1,128], index: 4, kind: input, shape index: {}]   ;;  %s1647_s5 = inlined_call_operand.vmem [shape: f32[1,128], index: 5, kind: input, shape index: {}]   ;;  %s1648_s6 = inlined_call_operand.vmem [shape: f32[1,128], index: 6, kind: input, shape index: {}]   ;;  %s1649_s7 = inlined_call_operand.hbm [shape: bf16[128,128], index: 7, kind: input, shape index: {}]   ;;  %s1650_s8 = inlined_call_operand.vmem [shape: f32[1,128], index: 8, kind: input, shape index: {}]   ;;  %s1651_s9 = inlined_call_operand.hbm [shape: f32[64,128], index: 9, kind: output, shape index: {}]  }
   0x1   :  { %16 = vsyncpa [#allocation3 + $0x1], 0 }
   0x2   :  { %17 = vsyncpa [#allocation6], 0 }
   0x3   :  { %18 = vsyncpa [#allocation4], 0 }
   0x4   :  { %20 = vsyncpa [#allocation4 + $0x1], 0  ;;  %s1346_s30 = smov 0   ;;  %s1348_s10 = smov 0  }
   0x5   :  { %s1350_s11 = smov 0   ;;  %s1352_s12 = smov 0  }
   0x6 LB: > { %s1367_s13 = sadd.s32 4294967295, %s1284_s12   ;;  %s905_s14 = sadd.s32 4294967294, %s1284_s12   ;;  %s1284_s12 = sphi %s1352_s12, %s1674_s12   ;;  %s1280_s11 = sphi %s1350_s11, %s1673_s11   ;;  %s1276_s10 = sphi %s1348_s10, %s1672_s10   ;;  %s1272_s30 = sphi %s1346_s30, %s1671_s30  }
   0x7   : > { %p46_p0 = scmp.ne.s32.totalorder %s1276_s10, %s1272_s30  ;;  %p1652_p1 = scmp.eq.s32.totalorder %s1367_s13, 0 }
   0x8   : > { %p244_p3 = scmp.eq.s32.totalorder %s905_s14, 1  ;;  %p906_p5 = scmp.ge.s32.totalorder %s1284_s12, 1 }
   0x9   : > { %p1376_p4 = por %p1652_p1, %p46_p0  ;;  %p251_p7 = scmp.lt.s32.totalorder %s1284_s12, 3 }
   0xa   : > { %p1381_p6 = por %p244_p3, %p46_p0  ;;  %s1286_s18 = smov [#allocation5]  }
   0xb   : > { %s1656_s15 = scalar_select %p1376_p4, 1, 0 }
   0xc   : > { %s1657_s16 = scalar_select %p1381_p6, 1, 0 }
   0xd   : > { %p1386_p8 = pnand %p906_p5, %p251_p7  ;;  %s269_s19 = sshll.u32 %s1286_s18, 4  ;;  %s1390_s19 = int_to_ptr.vmem [resolvable:$true] %s269_s19 }
   0xe   : > { %1658 = sst [smem:[#allocation12_spill]] %s1657_s16  ;;  %s1287_s21 = smov [#allocation7]  }
   0xf   : > { %p1019_p9 = pneg %p1386_p8  ;;  %s291_s22 = sshll.u32 %s1287_s21, 4  ;;  %s1401_s22 = int_to_ptr.vmem [resolvable:$true] %s291_s22 }
  0x10   : > { %s1128_s25 = scalar_lea.hbm %s1645_s3, 1024 }
  0x11   : > { %p1397_p11 = pnand %p1019_p9, %p1652_p1  ;;  %p1129_p12 = scmp.ne.s32.totalorder %s1645_s3, %s1128_s25 }
  0x12   : > { %p1135_p5 = scmp.lt.u32.totalorder %s1128_s25, %s1645_s3 }
  0x13   : > { %p1130_p13 = pneg %p1397_p11 }
  0x15   : > { %p1131_p0 = pnand %p1130_p13, %p1129_p12 }
  0x17   : > { %p1132_p3 = pneg %p1131_p0 }
  0x19   : > { %p1137_p7 = pnand %p1135_p5, %p1132_p3 }
  0x1b   : > { %1140 = shalt.err (!%p1137_p7)
}
  0x1c   : > { %s1141_s14 = scalar_lea.vmem %s1390_s19, 1024  ;;  %p1149_p2 = scmp.lt.s32.totalorder %s1390_s19, %s1390_s19 }
  0x1d   : > { %p1142_p9 = scmp.ne.s32.totalorder %s1390_s19, %s1141_s14  ;;  %p1150_p12 = scmp.lt.s32.totalorder %s1141_s14, %s1141_s14 }
  0x1f   : > { %p1144_p10 = pnand %p1142_p9, %p1130_p13  ;;  %p1151_p0 = por %p1150_p12, %p1149_p2 }
  0x21   : > { %p1145_p1 = pneg %p1144_p10 }
  0x23   : > { %p1152_p6 = pnand %p1151_p0, %p1145_p1 }
  0x25   : > { %1155 = shalt.err (!%p1152_p6)
}
  0x26   : > { %s1288_s18 = smov 64   ;;  %s1289_s21 = smov 4  }
  0x27   : > { %1022 = dma.hbm_to_vmem [thread:$0]  (!%p1397_p11), %s1645_s3, 1024, %s1390_s19, [#allocation6], %s1288_s18, %s1288_s18, %s1289_s21  }
  0x28   : > { %s1156_s27 = scalar_lea.hbm %s1649_s7, 1024 }
  0x29   : > { %p1157_p2 = scmp.ne.s32.totalorder %s1649_s7, %s1156_s27  ;;  %p1163_p10 = scmp.lt.u32.totalorder %s1156_s27, %s1649_s7 }
  0x2b   : > { %p1159_p1 = pnand %p1157_p2, %p1130_p13 }
  0x2d   : > { %p1160_p6 = pneg %p1159_p1 }
  0x2f   : > { %p1165_p3 = pnand %p1163_p10, %p1160_p6 }
  0x31   : > { %1168 = shalt.err (!%p1165_p3)
}
  0x32   : > { %s1169_s19 = scalar_lea.vmem %s1401_s22, 1024  ;;  %p1177_p12 = scmp.lt.s32.totalorder %s1401_s22, %s1401_s22 }
  0x33   : > { %p1170_p5 = scmp.ne.s32.totalorder %s1401_s22, %s1169_s19  ;;  %p1178_p0 = scmp.lt.s32.totalorder %s1169_s19, %s1169_s19 }
  0x35   : > { %p1172_p7 = pnand %p1170_p5, %p1130_p13  ;;  %p1179_p2 = por %p1178_p0, %p1177_p12 }
  0x37   : > { %p1173_p9 = pneg %p1172_p7 }
  0x39   : > { %p1180_p1 = pnand %p1179_p2, %p1173_p9 }
  0x3b   : > { %1183 = shalt.err (!%p1180_p1)
}
  0x3c   : > { %1025 = dma.hbm_to_vmem [thread:$0]  (!%p1397_p11), %s1649_s7, 1024, %s1401_s22, [#allocation6], %s1288_s18, %s1288_s18, %s1289_s21  }
  0x3d   : > { %s1456_s24 = sadd.s32 1, %s1284_s12   ;;  %s33_s20 = sadd.s32 1, %s1280_s11 }
  0x3e   : > { %s30_s25 = ssub.s32 %s1284_s12, %s1456_s24  ;;  %p40_p13 = scmp.ne.s32.totalorder %s1280_s11, %s1276_s10 }
  0x3f   : > { %p31_p6 = scmp.eq.s32.totalorder %s30_s25, 0  ;;  %p41_p10 = scmp.eq.s32.totalorder %s1284_s12, 0 }
  0x40   : > { %p1661_p3 = scmp.eq.s32.totalorder %s1367_s13, 1  ;;  %p1036_p7 = scmp.lt.s32.totalorder %s1284_s12, 2 }
  0x41   : > { %s1472_s27 = scalar_select %p31_p6, %s1280_s11, %s33_s20  }
  0x42   : > { %p1466_p5 = por %p1661_p3, %p40_p13  ;;  %p42_p9 = por %p41_p10, %p40_p13 }
  0x43   : > { %s308_s28 = sand.u32 1, %s1280_s11   ;;  %s945_s22 = sshll.u32 %s1284_s12, 9 }
  0x44   : > { %s1662_s26 = scalar_select %p1466_p5, 1, 0 }
  0x45   : > { %s910_s29 = sshll.u32 %s308_s28, 5  ;;  %s1479_s14 = scalar_lea.hbm %s1642_s0, %s945_s22 }
  0x46   : > { %s312_s19 = scalar_lea.vmem [#allocation2], %s910_s29  ;;  %p1483_p11 = pnand %p1036_p7, %p42_p9 }
  0x47   : > { %s319_s16 = sshll.u32 %s312_s19, 4  ;;  %s1487_s20 = scalar_lea.sflag [#allocation3], %s308_s28  ;;  %s1481_s16 = int_to_ptr.vmem [resolvable:$true] %s319_s16 }
  0x48   : > { %s1184_s25 = scalar_lea.hbm %s1479_s14, 512  ;;  %p1186_p0 = pneg %p1483_p11 }
  0x49   : > { %p1185_p12 = scmp.ne.s32.totalorder %s1479_s14, %s1184_s25  ;;  %s1189_s18 = scalar_lea.hbm %s1642_s0, 1024 }
  0x4a   : > { %p1190_p13 = scmp.lt.u32.totalorder %s1479_s14, %s1642_s0  ;;  %p1191_p6 = scmp.lt.u32.totalorder %s1189_s18, %s1184_s25 }
  0x4b   : > { %p1187_p2 = pnand %p1186_p0, %p1185_p12  ;;  %p1193_p3 = scmp.lt.u32.totalorder %s1184_s25, %s1479_s14 }
  0x4c   : > { %p1192_p10 = por %p1191_p6, %p1190_p13 }
  0x4d   : > { %p1188_p1 = pneg %p1187_p2 }
  0x4e   : > { %p1194_p7 = por %p1193_p3, %p1192_p10 }
  0x50   : > { %p1195_p9 = pnand %p1194_p7, %p1188_p1 }
  0x52   : > { %1198 = shalt.err (!%p1195_p9)
}
  0x53   : > { %s1199_s28 = scalar_lea.vmem %s1481_s16, 512  ;;  %s1290_s29 = smov [#allocation2]  }
  0x54   : > { %p1200_p12 = scmp.ne.s32.totalorder %s1481_s16, %s1199_s28  ;;  %s1204_s22 = sshll.u32 %s1290_s29, 4  ;;  %s1205_s22 = int_to_ptr.vmem [resolvable:$false] %s1204_s22 }
  0x55   : > { %s1206_s21 = scalar_lea.vmem %s1205_s22, 1024  ;;  %p1207_p4 = scmp.lt.s32.totalorder %s1481_s16, %s1205_s22 }
  0x56   : > { %p1202_p2 = pnand %p1200_p12, %p1186_p0  ;;  %p1208_p13 = scmp.lt.s32.totalorder %s1206_s21, %s1199_s28 }
  0x58   : > { %p1203_p5 = pneg %p1202_p2  ;;  %p1209_p6 = por %p1208_p13, %p1207_p4 }
  0x5a   : > { %p1210_p10 = pnand %p1209_p6, %p1203_p5 }
  0x5c   : > { %1213 = shalt.err (!%p1210_p10)
}
  0x5d   : > { %s1291_s25 = smov 128   ;;  %s1292_s18 = smov 8  }
  0x5e   : > { %1029 = dma.hbm_to_vmem [thread:$0]  (!%p1483_p11), %s1479_s14, 512, %s1481_s16, %s1487_s20, %s1291_s25, %s1291_s25, %s1292_s18  }
  0x5f   : > { %331 = sbr.rel (%p1386_p8) target bundleno = 1220 (0x4c4), region = 56  ;;  %s1518_s19 = sand.u32 (!%p1386_p8), 1, %s1276_s10  }
  0x60   : > { %s914_s28 = sshll.u32 (!%p1386_p8), %s1518_s19, 5  ;;  %s334_s29 = scalar_lea.sflag (!%p1386_p8), [#allocation3], %s1518_s19 }
  0x61   : > { %s337_s22 = scalar_lea.vmem (!%p1386_p8), [#allocation2], %s914_s28  ;;  %p1664_p4 = scmp.ne.s32.totalorder (!%p1386_p8), %s1656_s15, 0 }
  0x66   : > { %1259 = dma.done.wait (%p1664_p4), %s334_s29, 512  }
  0x67   : > { %1261 = vsyncadd (%p1664_p4), %s334_s29, 4294966784  ;;  %p1665_p5 = scmp.eq.s32.totalorder %s1367_s13, 0 }
  0x69   : > { %1263 = dma.done.wait (%p1665_p5), [#allocation6], 2048   ;;  %p1666_p8 = pmov %p1665_p5 }
  0x6a   : > { %v383_v0 = vld [vmem:[%s337_s22] sm:$0xff]  ;;  %v385_v1 = vld [vmem:[%s337_s22 + $0x10] sm:$0xff]  ;;  %v384_v2 = vld [vmem:[%s337_s22 + $0x8] sm:$0xff]  ;;  %s946_s17 = sshll.u32 %s1367_s13, 9  ;;  %s379_s14 = scalar_lea.vmem [#allocation8], %s914_s28 }
  0x6b   : > { %1265 = vsyncadd (%p1666_p8), [#allocation6], 4294965248  ;;  %406 = vadd.xlane.f32.xlu0 %v383_v0  ;;  %410 = vadd.xlane.f32.xlu1 %v385_v1  ;;  %v386_v3 = vld [vmem:[%s337_s22 + $0x18] sm:$0xff]  ;;  %v1080_v20 = vld [vmem:[#allocation5] sm:$0xff]   ;;  %s813_s16 = sshll.u32 %s379_s14, 4  ;;  %s1596_s21 = scalar_lea.hbm %s1651_s9, %s946_s17  ;;  %s1598_s16 = int_to_ptr.vmem [resolvable:$true] %s813_s16 }
  0x6c   : > { %967 = vmatprep.subr.bf16.mxu0 %v1080_v20  ;;  %v1081_v21 = vld [vmem:[#allocation5 + $0x8] sm:$0xff]   ;;  %v1082_v22 = vld [vmem:[#allocation5 + $0x10] sm:$0xff]   ;;  %v1083_v23 = vld [vmem:[#allocation5 + $0x18] sm:$0xff]   ;;  %s800_s13 = scalar_lea.sflag [#allocation4], %s1518_s19  ;;  %s1214_s28 = scalar_lea.vmem %s1598_s16, 512 }
  0x6d   : > { %968 = vmatpush3.bf16.msra.mxu0 %v1080_v20  ;;  %v1084_v24 = vld [vmem:[#allocation5 + $0x20] sm:$0xff]   ;;  %v1085_v25 = vld [vmem:[#allocation5 + $0x28] sm:$0xff]   ;;  %v1086_v26 = vld [vmem:[#allocation5 + $0x30] sm:$0xff]   ;;  %p1215_p11 = scmp.ne.s32.totalorder %s1598_s16, %s1214_s28  ;;  %p1667_p0 = scmp.ne.s32.totalorder %s1662_s26, 0 }
  0x6e   : > { %969 = vmatprep.subr.bf16.mxu0 %v1081_v21  ;;  %v1087_v27 = vld [vmem:[#allocation5 + $0x38] sm:$0xff]   ;;  %v918_v54 = vld [vmem:[%s1643_s1] ss:$0 sm:$0xff]  ;;  %s1293_s25 = smov [#allocation8]  }
  0x6f   : > { %408 = vadd.xlane.f32.xlu0 %v384_v2  ;;  %412 = vadd.xlane.f32.xlu1 %v386_v3  ;;  %v919_v59 = vld [vmem:[%s1644_s2] ss:$0 sm:$0xff]  ;;  %p1216_p1 = pnand %p1215_p11, %p1667_p0  ;;  %s1218_s18 = sshll.u32 %s1293_s25, 4  ;;  %s1219_s18 = int_to_ptr.vmem [resolvable:$false] %s1218_s18 }
  0x70   : > { %s1220_s29 = scalar_lea.vmem %s1219_s18, 1024  ;;  %p1221_p7 = scmp.lt.s32.totalorder %s1598_s16, %s1219_s18 }
  0x71   : > { %970 = vmatpush3.bf16.msra.mxu0 %v1081_v21  ;;  %v1088_v21 = vld [vmem:[#allocation7] sm:$0xff]   ;;  %p1217_p3 = pneg %p1216_p1  ;;  %p1222_p9 = scmp.lt.s32.totalorder %s1220_s29, %s1214_s28 }
  0x72   : > { %971 = vmatprep.subr.bf16.mxu0 %v1082_v22  ;;  %987 = vmatprep.subr.bf16.mxu1 %v1088_v21 }
  0x73   : > { %988 = vmatpush3.bf16.msra.mxu1 %v1088_v21  ;;  %p1223_p12 = por %p1222_p9, %p1221_p7 }
  0x75   : > { %972 = vmatpush3.bf16.msra.mxu0 %v1082_v22  ;;  %p1224_p2 = pnand %p1223_p12, %p1217_p3 }
  0x76   : > { %973 = vmatprep.subr.bf16.mxu0 %v1083_v23 }
  0x79   : > { %974 = vmatpush3.bf16.msra.mxu0 %v1083_v23 }
  0x7a   : > { %975 = vmatprep.subr.bf16.mxu0 %v1084_v24 }
  0x7d   : > { %976 = vmatpush3.bf16.msra.mxu0 %v1084_v24 }
  0x7e   : > { %977 = vmatprep.subr.bf16.mxu0 %v1085_v25 }
  0x81   : > { %978 = vmatpush3.bf16.msra.mxu0 %v1085_v25 }
  0x82   : > { %979 = vmatprep.subr.bf16.mxu0 %v1086_v26 }
  0x85   : > { %980 = vmatpush3.bf16.msra.mxu0 %v1086_v26 }
  0x86   : > { %981 = vmatprep.subr.bf16.mxu0 %v1087_v27 }
  0x89   : > { %982 = vmatpush3.bf16.msra.mxu0 %v1087_v27 }
  0xf8   : > { %v407_v4 = vpop.xlane.xlu0 %406  ;;  %v411_v5 = vpop.xlane.xlu1 %410 }
  0xf9   : > { %v414_v6 = vmul.f32 0.03125, %v407_v4  ;;  %v416_v7 = vmul.f32 0.03125, %v411_v5 }
  0xfb   : > { %v1532_v8 = vsub.f32 %v383_v0, %v414_v6  ;;  %v1534_v9 = vsub.f32 %v385_v1, %v416_v7  ;;  %v434_v28 = vmul.f32 96.0, %v414_v6  ;;  %v436_v31 = vmul.f32 96.0, %v416_v7 }
  0xfc   : > { %v409_v10 = vpop.xlane.xlu0 %408  ;;  %v413_v11 = vpop.xlane.xlu1 %412 }
  0xfd   : > { %v415_v12 = vmul.f32 0.03125, %v409_v10  ;;  %v417_v13 = vmul.f32 0.03125, %v413_v11  ;;  %v422_v14 = vmul.f32 %v1532_v8, %v1532_v8  ;;  %v424_v15 = vmul.f32 %v1534_v9, %v1534_v9 }
  0xfe   : > { %v438_v29 = vmul.f32 %v434_v28, %v414_v6  ;;  %v440_v36 = vmul.f32 %v436_v31, %v416_v7 }
  0xff   : > { %426 = vadd.xlane.f32.xlu0 %v422_v14  ;;  %v1540_v16 = vsub.f32 %v384_v2, %v415_v12  ;;  %v1542_v17 = vsub.f32 %v386_v3, %v417_v13  ;;  %v435_v30 = vmul.f32 96.0, %v415_v12  ;;  %v437_v37 = vmul.f32 96.0, %v417_v13 }
 0x101   : > { %v423_v18 = vmul.f32 %v1540_v16, %v1540_v16  ;;  %v425_v19 = vmul.f32 %v1542_v17, %v1542_v17  ;;  %v439_v35 = vmul.f32 %v435_v30, %v415_v12  ;;  %v441_v45 = vmul.f32 %v437_v37, %v417_v13 }
 0x103   : > { %430 = vadd.xlane.f32.xlu0 %v424_v15  ;;  %428 = vadd.xlane.f32.xlu1 %v423_v18 }
 0x107   : > { %432 = vadd.xlane.f32.xlu1 %v425_v19 }
 0x18c   : > { %v427_v32 = vpop.xlane.xlu0 %426 }
 0x18d   : > { %v442_v33 = vsub.f32 %v427_v32, %v438_v29 }
 0x18f   : > { %v446_v34 = vmul.f32 0.03125, %v442_v33 }
 0x190   : > { %v429_v38 = vpop.xlane.xlu1 %428  ;;  %v431_v39 = vpop.xlane.xlu0 %430 }
 0x191   : > { %v450_v40 = vadd.f32 1e-05, %v446_v34  ;;  %v443_v41 = vsub.f32 %v429_v38, %v439_v35  ;;  %v444_v42 = vsub.f32 %v431_v39, %v440_v36  ;;  %v1089_v38 = vld [vmem:[#allocation7 + $0x8] sm:$0xff]   ;;  %v1090_v39 = vld [vmem:[#allocation7 + $0x10] sm:$0xff]  }
 0x192   : > { %989 = vmatprep.subr.bf16.mxu1 %v1089_v38 }
 0x193   : > { %1096 = vrsqrt.f32 %v450_v40  ;;  %v447_v43 = vmul.f32 0.03125, %v443_v41  ;;  %v448_v44 = vmul.f32 0.03125, %v444_v42  ;;  %990 = vmatpush3.bf16.msra.mxu1 %v1089_v38  ;;  %v1091_v40 = vld [vmem:[#allocation7 + $0x18] sm:$0xff]   ;;  %v1092_v41 = vld [vmem:[#allocation7 + $0x20] sm:$0xff]   ;;  %v1093_v42 = vld [vmem:[#allocation7 + $0x28] sm:$0xff]  }
 0x194   : > { %v433_v46 = vpop.xlane.xlu1 %432  ;;  %991 = vmatprep.subr.bf16.mxu1 %v1090_v39 }
 0x195   : > { %v451_v47 = vadd.f32 1e-05, %v447_v43  ;;  %v452_v48 = vadd.f32 1e-05, %v448_v44  ;;  %v445_v49 = vsub.f32 %v433_v46, %v441_v45  ;;  %v1094_v43 = vld [vmem:[#allocation7 + $0x30] sm:$0xff]   ;;  %v1095_v44 = vld [vmem:[#allocation7 + $0x38] sm:$0xff]  }
 0x197   : > { %1098 = vrsqrt.f32 %v451_v47  ;;  %v449_v50 = vmul.f32 0.03125, %v445_v49  ;;  %992 = vmatpush3.bf16.msra.mxu1 %v1090_v39 }
 0x198   : > { %1100 = vrsqrt.f32 %v452_v48  ;;  %993 = vmatprep.subr.bf16.mxu1 %v1091_v40 }
 0x199   : > { %v453_v51 = vadd.f32 1e-05, %v449_v50 }
 0x19b   : > { %1102 = vrsqrt.f32 %v453_v51  ;;  %994 = vmatpush3.bf16.msra.mxu1 %v1091_v40 }
 0x19c   : > { %995 = vmatprep.subr.bf16.mxu1 %v1092_v41 }
 0x19d   : > { %v1097_v52 = vpop.eup %1096 }
 0x19e   : > { %v458_v53 = vmul.f32 %v1097_v52, %v1532_v8  ;;  %v920_v8 = vld [vmem:[%s1646_s4] ss:$0 sm:$0xff] }
 0x19f   : > { %996 = vmatpush3.bf16.msra.mxu1 %v1092_v41 }
 0x1a0   : > { %v468_v58 = vmul.f32 %v918_v54, %v458_v53  ;;  %997 = vmatprep.subr.bf16.mxu1 %v1093_v42 }
 0x1a1   : > { %v1099_v55 = vpop.eup %1098 }
 0x1a2   : > { %v1101_v56 = vpop.eup %1100  ;;  %v459_v57 = vmul.f32 %v1099_v55, %v1540_v16  ;;  %v478_v63 = vadd.f32 %v919_v59, %v468_v58 }
 0x1a3   : > { %v460_v60 = vmul.f32 %v1101_v56, %v1534_v9  ;;  %998 = vmatpush3.bf16.msra.mxu1 %v1093_v42 }
 0x1a4   : > { %v469_v61 = vmul.f32 %v918_v54, %v459_v57  ;;  %999 = vmatprep.subr.bf16.mxu1 %v1094_v43 }
 0x1a5   : > { %v1103_v62 = vpop.eup %1102  ;;  %v470_v2 = vmul.f32 %v918_v54, %v460_v60 }
 0x1a6   : > { %v479_v0 = vadd.f32 %v919_v59, %v469_v61  ;;  %v461_v1 = vmul.f32 %v1103_v62, %v1542_v17 }
 0x1a7   : > { %v480_v5 = vadd.f32 %v919_v59, %v470_v2  ;;  %1000 = vmatpush3.bf16.msra.mxu1 %v1094_v43 }
 0x1a8   : > { %v482_v3 = vpack.c.bf16 %v479_v0, %v478_v63  ;;  %v471_v4 = vmul.f32 %v918_v54, %v461_v1  ;;  %1001 = vmatprep.subr.bf16.mxu1 %v1095_v44 }
 0x1aa   : > { %983 = vmatprep.mubr.bf16.mxu0 %v482_v3  ;;  %v481_v6 = vadd.f32 %v919_v59, %v471_v4 }
 0x1ab   : > { %1002 = vmatpush3.bf16.msra.mxu1 %v1095_v44 }
 0x1ac   : > { %v483_v7 = vpack.c.bf16 %v481_v6, %v480_v5  ;;  %v929_v6 = vld [vmem:[%s1647_s5] ss:$0 sm:$0xff] }
 0x1ae   : > { %984 = vmatmul.mubr.bf16.vlgmr.msra.gmra.mrb[0].mxu0 %v483_v7 }
 0x281   : > { %v985_v10 = vpop.f32.mrb[0].mxu0 }
 0x282   : > { %v572_v9 = vpop.f32.mrb[1].mxu0  ;;  %v581_v14 = vadd.f32 %v985_v10, %v920_v8 }
 0x283   : > { %v573_v11 = vadd.f32 %v920_v8, %v572_v9  ;;  %v986_v12 = vpop.f32.mrb[2].mxu0 }
 0x284   : > { %v575_v13 = vpop.f32.mrb[3].mxu0  ;;  %v584_v16 = vadd.f32 %v986_v12, %v920_v8  ;;  %v930_v12 = vld [vmem:[%s1648_s6] ss:$0 sm:$0xff] }
 0x285   : > { %1104 = vtanh.f32 %v573_v11  ;;  %v576_v15 = vadd.f32 %v920_v8, %v575_v13 }
 0x287   : > { %1106 = vtanh.f32 %v576_v15 }
 0x288   : > { %1108 = vtanh.f32 %v581_v14 }
 0x289   : > { %1110 = vtanh.f32 %v584_v16 }
 0x28f   : > { %v1105_v17 = vpop.eup %1104 }
 0x290   : > { %610 = vadd.xlane.f32.xlu0 %v1105_v17 }
 0x291   : > { %v1107_v18 = vpop.eup %1106 }
 0x292   : > { %612 = vadd.xlane.f32.xlu1 %v1107_v18  ;;  %v1109_v19 = vpop.eup %1108 }
 0x293   : > { %v1111_v20 = vpop.eup %1110 }
 0x294   : > { %614 = vadd.xlane.f32.xlu0 %v1109_v19 }
 0x296   : > { %616 = vadd.xlane.f32.xlu1 %v1111_v20 }
 0x31d   : > { %v611_v22 = vpop.xlane.xlu0 %610 }
 0x31e   : > { %v618_v23 = vmul.f32 0.015625, %v611_v22 }
 0x31f   : > { %v613_v24 = vpop.xlane.xlu1 %612 }
 0x320   : > { %v619_v25 = vmul.f32 0.015625, %v613_v24  ;;  %v1561_v26 = vsub.f32 %v1105_v17, %v618_v23  ;;  %v638_v45 = vmul.f32 64.0, %v618_v23 }
 0x321   : > { %v615_v27 = vpop.xlane.xlu0 %614 }
 0x322   : > { %v620_v28 = vmul.f32 0.015625, %v615_v27  ;;  %v626_v29 = vmul.f32 %v1561_v26, %v1561_v26  ;;  %v1565_v30 = vsub.f32 %v1107_v18, %v619_v25  ;;  %v639_v46 = vmul.f32 64.0, %v619_v25 }
 0x323   : > { %v617_v31 = vpop.xlane.xlu1 %616  ;;  %v642_v47 = vmul.f32 %v638_v45, %v618_v23 }
 0x324   : > { %v621_v32 = vmul.f32 0.015625, %v617_v31  ;;  %630 = vadd.xlane.f32.xlu0 %v626_v29  ;;  %v627_v33 = vmul.f32 %v1565_v30, %v1565_v30  ;;  %v1569_v34 = vsub.f32 %v1109_v19, %v620_v28  ;;  %v640_v48 = vmul.f32 64.0, %v620_v28 }
 0x325   : > { %v643_v51 = vmul.f32 %v639_v46, %v619_v25  ;;  %v931_v25 = vld [vmem:[%s1650_s8] ss:$0 sm:$0xff] }
 0x326   : > { %632 = vadd.xlane.f32.xlu1 %v627_v33  ;;  %v628_v35 = vmul.f32 %v1569_v34, %v1569_v34  ;;  %v1573_v36 = vsub.f32 %v1111_v20, %v621_v32  ;;  %v641_v52 = vmul.f32 64.0, %v621_v32  ;;  %v644_v56 = vmul.f32 %v640_v48, %v620_v28 }
 0x328   : > { %634 = vadd.xlane.f32.xlu0 %v628_v35  ;;  %v629_v37 = vmul.f32 %v1573_v36, %v1573_v36  ;;  %v645_v61 = vmul.f32 %v641_v52, %v621_v32 }
 0x32a   : > { %636 = vadd.xlane.f32.xlu1 %v629_v37 }
 0x3b1   : > { %v631_v49 = vpop.xlane.xlu0 %630 }
 0x3b2   : > { %v646_v50 = vsub.f32 %v631_v49, %v642_v47 }
 0x3b3   : > { %v633_v53 = vpop.xlane.xlu1 %632 }
 0x3b4   : > { %v650_v54 = vmul.f32 0.015625, %v646_v50  ;;  %v647_v55 = vsub.f32 %v633_v53, %v643_v51 }
 0x3b5   : > { %v635_v57 = vpop.xlane.xlu0 %634 }
 0x3b6   : > { %v654_v58 = vadd.f32 1e-05, %v650_v54  ;;  %v651_v59 = vmul.f32 0.015625, %v647_v55  ;;  %v648_v60 = vsub.f32 %v635_v57, %v644_v56 }
 0x3b7   : > { %v637_v62 = vpop.xlane.xlu1 %636 }
 0x3b8   : > { %1112 = vrsqrt.f32 %v654_v58  ;;  %v655_v63 = vadd.f32 1e-05, %v651_v59  ;;  %v652_v0 = vmul.f32 0.015625, %v648_v60  ;;  %v649_v1 = vsub.f32 %v637_v62, %v645_v61 }
 0x3ba   : > { %1114 = vrsqrt.f32 %v655_v63  ;;  %v656_v2 = vadd.f32 1e-05, %v652_v0  ;;  %v653_v3 = vmul.f32 0.015625, %v649_v1 }
 0x3bc   : > { %1116 = vrsqrt.f32 %v656_v2  ;;  %v657_v4 = vadd.f32 1e-05, %v653_v3 }
 0x3be   : > { %1118 = vrsqrt.f32 %v657_v4 }
 0x3c2   : > { %v1113_v5 = vpop.eup %1112 }
 0x3c3   : > { %v662_v7 = vmul.f32 %v1113_v5, %v1561_v26 }
 0x3c4   : > { %v1115_v8 = vpop.eup %1114 }
 0x3c5   : > { %v663_v10 = vmul.f32 %v1115_v8, %v1565_v30  ;;  %v672_v9 = vmul.f32 %v929_v6, %v662_v7 }
 0x3c6   : > { %v1117_v11 = vpop.eup %1116 }
 0x3c7   : > { %v673_v13 = vmul.f32 %v929_v6, %v663_v10  ;;  %v664_v14 = vmul.f32 %v1117_v11, %v1569_v34  ;;  %v682_v16 = vadd.f32 %v930_v12, %v672_v9 }
 0x3c8   : > { %v1119_v15 = vpop.eup %1118 }
 0x3c9   : > { %v683_v17 = vadd.f32 %v930_v12, %v673_v13  ;;  %v665_v18 = vmul.f32 %v1119_v15, %v1573_v36  ;;  %v674_v19 = vmul.f32 %v929_v6, %v664_v14 }
 0x3cb   : > { %v686_v20 = vpack.c.bf16 %v683_v17, %v682_v16  ;;  %v675_v21 = vmul.f32 %v929_v6, %v665_v18  ;;  %v684_v22 = vadd.f32 %v930_v12, %v674_v19 }
 0x3cd   : > { %1003 = vmatprep.mubr.bf16.mxu1 %v686_v20  ;;  %v685_v23 = vadd.f32 %v930_v12, %v675_v21 }
 0x3cf   : > { %v687_v24 = vpack.c.bf16 %v685_v23, %v684_v22 }
 0x3d1   : > { %1004 = vmatmul.mubr.bf16.vlgmr.msra.gmra.mrb[0].mxu1 %v687_v24 }
 0x4a4   : > { %v1005_v26 = vpop.f32.mrb[0].mxu1 }
 0x4a5   : > { %v785_v27 = vadd.f32 %v1005_v26, %v931_v25  ;;  %v776_v28 = vpop.f32.mrb[1].mxu1 }
 0x4a6   : > { %v777_v29 = vadd.f32 %v931_v25, %v776_v28  ;;  %v1006_v30 = vpop.f32.mrb[2].mxu1 }
 0x4a7   : > { %1120 = vtanh.f32 %v785_v27  ;;  %v788_v31 = vadd.f32 %v1006_v30, %v931_v25  ;;  %v779_v32 = vpop.f32.mrb[3].mxu1 }
 0x4a8   : > { %1122 = vtanh.f32 %v777_v29  ;;  %v780_v33 = vadd.f32 %v931_v25, %v779_v32 }
 0x4a9   : > { %1124 = vtanh.f32 %v788_v31 }
 0x4aa   : > { %1126 = vtanh.f32 %v780_v33 }
 0x4b1   : > { %v1121_v34 = vpop.eup %1120 }
 0x4b2   : > { %v1123_v35 = vpop.eup %1122  ;;  %797 = vst [vmem:[%s379_s14 + $0x10] sm:$0xff] %v1121_v34 }
 0x4b3   : > { %v1125_v36 = vpop.eup %1124  ;;  %795 = vst [vmem:[%s379_s14] sm:$0xff] %v1123_v35 }
 0x4b4   : > { %v1127_v37 = vpop.eup %1126  ;;  %798 = vst [vmem:[%s379_s14 + $0x18] sm:$0xff] %v1125_v36 }
 0x4b5   : > { %796 = vst [vmem:[%s379_s14 + $0x8] sm:$0xff] %v1127_v37 }
 0x4b6   : > { %1227 = shalt.err (!%p1224_p2)
}
 0x4b7   : > { %s1228_s22 = scalar_lea.hbm %s1596_s21, 512  ;;  %s1232_s14 = scalar_lea.hbm %s1651_s9, 1024 }
 0x4b8   : > { %p1229_p13 = scmp.ne.s32.totalorder %s1596_s21, %s1228_s22  ;;  %p1233_p4 = scmp.lt.u32.totalorder %s1596_s21, %s1651_s9 }
 0x4b9   : > { %p1234_p5 = scmp.lt.u32.totalorder %s1232_s14, %s1228_s22  ;;  %p1236_p11 = scmp.lt.u32.totalorder %s1228_s22, %s1596_s21 }
 0x4ba   : > { %p1230_p6 = pnand %p1229_p13, %p1667_p0 }
 0x4bb   : > { %p1235_p8 = por %p1234_p5, %p1233_p4 }
 0x4bc   : > { %p1231_p10 = pneg %p1230_p6 }
 0x4bd   : > { %p1237_p1 = por %p1236_p11, %p1235_p8 }
 0x4bf   : > { %p1238_p3 = pnand %p1237_p1, %p1231_p10 }
 0x4c1   : > { %1241 = shalt.err (!%p1238_p3)
}
 0x4c2   : > { %s1294_s28 = smov 128   ;;  %s1295_s25 = smov 8  }
 0x4c3   : > { %1017 = dma.vmem_to_hbm [thread:$0]  (%p1667_p0), %s1598_s16, 512, %s1596_s21, %s800_s13, %s1294_s28, %s1294_s28, %s1295_s25  }
 0x4c4 PF: > { %s1668_s18 = sld [smem:[#allocation12_spill]]  ;;  %s828_s29 = sand.u32 1, %s1272_s30  }
 0x4c5   : > { %p1670_p9 = scmp.ge.s32.totalorder %s1284_s12, 2  ;;  %s829_s22 = scalar_lea.sflag [#allocation4], %s828_s29 }
 0x4ca   : > { %p1669_p7 = scmp.ne.s32.totalorder %s1668_s18, 0 }
 0x4cc   : > { %p1031_p12 = pnand %p1670_p9, %p1669_p7 }
 0x4ce   : > { %1267 = dma.done.wait (!%p1031_p12), %s829_s22, 512  }
 0x4cf   : > { %1269 = vsyncadd (!%p1031_p12), %s829_s22, 4294966784  ;;  %p23_p2 = scmp.ge.s32.totalorder %s1456_s24, 4   ;;  %s1671_s30 = smov %s1276_s10 }
 0x4d0   : > { %s1672_s10 = smov %s1280_s11  ;;  %s1673_s11 = smov %s1472_s27 }
 0x4d1   : > { %s1674_s12 = smov %s1456_s24  ;;  %25 = sbr.rel (!%p23_p2) target bundleno = 6 (0x6), region = 109 }
 0x4d8   :  { %834 = vsyncpa [#allocation3], 1 }
 0x4d9   :  { %836 = vsyncpa [#allocation3 + $0x1], 1 }
 0x4da   :  { %837 = vsyncpa [#allocation6], 1 }
 0x4db   :  { %838 = vsyncpa [#allocation4], 1 }
 0x4dc   :  { %840 = vsyncpa [#allocation4 + $0x1], 1 }

</bundles_post_ra>
